<compile_context>
chip_gen: v5e
topology: v5e:2x2
jax: 0.10.0
libtpu: 0.0.40
codegen_flags: <defaults>
</compile_context>

<pallas_src>
import jax
import jax.numpy as jnp
from jax.experimental import pallas as pl
from jax.experimental.pallas import tpu as pltpu


_VMEM_SPEC = pl.BlockSpec(memory_space=pltpu.MemorySpace.VMEM)
_SUBLANE = 8  # f32 sublane count of a vreg


# ------------------------------ fused kernel --------------------------------

def _make_fused_kernel(T, Bp, H, num_layers):
    """Fused stacked LSTM (zero init state) + relu->fc1->relu->fc2 head.

    Ref order:
      inputs : x(T*Bp, D) f32,
               w_ih0_t(D,4H) bf16, w_hh0_t(H,4H) bf16, b0(1,4H) f32,
               [w_cat_l_t(2H,4H) bf16, b_l(1,4H) f32]  for layers 1..L-1,
               fc1_w_t(H,128) bf16, fc1_b(1,128) f32,
               fc2_w_t(128,n_out) bf16, fc2_b(1,n_out) f32
      output : out(num_layers*Bp, n_out) f32
      scratch: none (everything lives in vregs)
    """
    BF = jnp.bfloat16
    F32 = jnp.float32

    def kernel(*refs):
        idx = 0
        x_ref = refs[idx]; idx += 1
        w_ih0_ref, w_hh0_ref, b0_ref = refs[idx:idx + 3]; idx += 3
        upper_refs = []
        for _ in range(num_layers - 1):
            upper_refs.append((refs[idx], refs[idx + 1])); idx += 2
        fc1_w_ref, fc1_b_ref, fc2_w_ref, fc2_b_ref = refs[idx:idx + 4]; idx += 4
        out_ref = refs[idx]

        def lstm_cell(gates, c_prev):
            # Full 4H(=128)-lane activations: 2 EUP pushes on `gates` + 1 on c_new.
            # sigmoid(x) == 0.5*(1 + tanh(x/2))  (exact identity, single tanh push).
            sig = 0.5 * (jnp.tanh(gates * 0.5) + 1.0)
            th = jnp.tanh(gates)
            i_g = sig[:, 0 * H:1 * H]
            f_g = sig[:, 1 * H:2 * H]
            g_g = th[:, 2 * H:3 * H]
            o_g = sig[:, 3 * H:4 * H]
            c_new = f_g * c_prev + i_g * g_g
            h_new = o_g * jnp.tanh(c_new)
            return h_new, c_new

        # Hoisted layer-0 input projection: ONE (T*Bp, D) @ (D, 4H) MXU matmul
        # fully outside the serial recurrence; result stays in vregs.
        gx0 = jnp.dot(x_ref[...].astype(BF), w_ih0_ref[...],
                      preferred_element_type=F32) + b0_ref[...]

        # Hoist loop-invariant weight loads and bias broadcasts out of the recurrence.
        w_hh0 = w_hh0_ref[...]                                       # (H, 4H) bf16
        uppers = [(w_ref[...], jnp.broadcast_to(b_ref[...], (Bp, 4 * H)))
                  for (w_ref, b_ref) in upper_refs]

        h = [jnp.zeros((Bp, H), F32) for _ in range(num_layers)]
        c = [jnp.zeros((Bp, H), F32) for _ in range(num_layers)]

        # Fully unrolled recurrence; state carried in vregs only (no VMEM stores).
        # Layer l at step t depends only on h[l-1] at step t and h[l] at step t-1,
        # so the unrolled graph is a wavefront the scheduler can overlap.
        for t in range(T):
            gates0 = gx0[t * Bp:(t + 1) * Bp, :] + jnp.dot(
                h[0].astype(BF), w_hh0, preferred_element_type=F32)
            h[0], c[0] = lstm_cell(gates0, c[0])
            for l in range(1, num_layers):
                w_cat, b_full = uppers[l - 1]
                inp = jnp.concatenate([h[l - 1], h[l]], axis=1).astype(BF)  # (Bp, 2H)
                gates = jnp.dot(inp, w_cat, preferred_element_type=F32) + b_full
                h[l], c[l] = lstm_cell(gates, c[l])

        # Fused head on hn.view(-1, H): relu -> fc_1 -> relu -> fc_2 (all in vregs).
        hn = jnp.maximum(jnp.concatenate(h, axis=0), 0.0)            # (L*Bp, H)
        z = jnp.dot(hn.astype(BF), fc1_w_ref[...],
                    preferred_element_type=F32) + fc1_b_ref[...]
        z = jnp.maximum(z, 0.0)
        # NOTE: n_out=3 -> masked vst.msk store; negligible at this size (pad/slice
        # to a 128-lane multiple if the head output ever becomes non-trivial).
        out_ref[...] = jnp.dot(z.astype(BF), fc2_w_ref[...],
                               preferred_element_type=F32) + fc2_b_ref[...]

    return kernel


# --------------------------- parameter packing -------------------------------

def _pack_params_for_kernel(raw):
    """PyTorch-layout params -> kernel operands (transposed, fused, bf16 matmul weights)."""
    BF = jnp.bfloat16
    layers = raw["layers"]
    w_ih0, w_hh0, b_ih0, b_hh0 = layers[0]
    packed = {
        "w_ih0": w_ih0.T.astype(BF),                              # (D, 4H)
        "w_hh0": w_hh0.T.astype(BF),                              # (H, 4H)
        "b0": (b_ih0 + b_hh0).reshape(1, -1),                     # (1, 4H) f32
        "upper": [],
        "fc1_w": raw["fc1_w"].T.astype(BF),                       # (H, 128)
        "fc1_b": raw["fc1_b"].reshape(1, -1),
        "fc2_w": raw["fc2_w"].T.astype(BF),                       # (128, n_out)
        "fc2_b": raw["fc2_b"].reshape(1, -1),
    }
    for (w_ih, w_hh, b_ih, b_hh) in layers[1:]:
        w_cat = jnp.concatenate([w_ih.T, w_hh.T], axis=0).astype(BF)  # (2H, 4H)
        packed["upper"].append((w_cat, (b_ih + b_hh).reshape(1, -1)))
    return packed


# --------------------------------- wrapper ----------------------------------

def sentiment_price_lstm_forward(x, raw_params):
    """Forward pass equivalent to SentimentPriceLSTM.forward (eval/inference mode).

    x : (B, T, input_size) float32, batch_first like PyTorch.
    Returns (num_layers * B, n_steps_out)  — hn.view(-1, H) -> relu -> fc1 -> relu -> fc2.
    """
    B, T, D = x.shape
    num_layers = len(raw_params["layers"])
    H = raw_params["layers"][0][1].shape[1]
    n_out = raw_params["fc2_w"].shape[0]

    # Pad batch to a sublane multiple so every per-step row access is a full,
    # unmasked (8,128) tile.  Padded rows carry harmless garbage and are sliced off.
    Bp = max(_SUBLANE, ((B + _SUBLANE - 1) // _SUBLANE) * _SUBLANE)

    # Single tiny transpose+pad for the kernel input; all other intermediates
    # (layer-1 inputs, hn, fc activations) never leave vregs/VMEM.
    x_tm = jnp.transpose(x, (1, 0, 2))                       # (T, B, D)
    x_tm = jnp.pad(x_tm, ((0, 0), (0, Bp - B), (0, 0)))      # (T, Bp, D)
    x_flat = x_tm.reshape(T * Bp, D)

    p = _pack_params_for_kernel(raw_params)
    operands = [x_flat, p["w_ih0"], p["w_hh0"], p["b0"]]
    for (w_cat, b) in p["upper"]:
        operands += [w_cat, b]
    operands += [p["fc1_w"], p["fc1_b"], p["fc2_w"], p["fc2_b"]]

    kernel = _make_fused_kernel(T, Bp, H, num_layers)

    # TODO(synk): nn.LSTM inter-layer dropout (p=0.2) applies only in training mode;
    # eval/inference semantics implemented here (no dropout).
    # NOTE: for large T/B this gridless call should become a T-chunked grid (h/c
    # carried in scratch, reduction axis "arbitrary", explicit vmem_limit_bytes) and,
    # on v7x, grow a batch-parallel grid axis to use both TensorCores; unnecessary
    # at these shapes.
    out_full = pl.pallas_call(
        kernel,
        out_shape=jax.ShapeDtypeStruct((num_layers * Bp, n_out), jnp.float32),
        in_specs=[_VMEM_SPEC] * len(operands),
        out_specs=_VMEM_SPEC,
    )(*operands)

    # Drop padded batch rows.
    return out_full.reshape(num_layers, Bp, n_out)[:, :B, :].reshape(num_layers * B, n_out)


# ---------------------------- pure-JAX reference -----------------------------

def _reference_forward(x, raw):
    """Straightforward f32 jnp implementation (same math as the PyTorch module, eval mode)."""
    B, T, _ = x.shape
    layer_in = jnp.transpose(x, (1, 0, 2))                   # (T, B, D)
    h_finals = []
    for (w_ih, w_hh, b_ih, b_hh) in raw["layers"]:
        H = w_hh.shape[1]
        h = jnp.zeros((B, H), jnp.float32)
        c = jnp.zeros((B, H), jnp.float32)
        ys = []
        for t in range(T):
            gates = layer_in[t] @ w_ih.T + h @ w_hh.T + b_ih + b_hh
            i_g = jax.nn.sigmoid(gates[:, 0 * H:1 * H])
            f_g = jax.nn.sigmoid(gates[:, 1 * H:2 * H])
            g_g = jnp.tanh(gates[:, 2 * H:3 * H])
            o_g = jax.nn.sigmoid(gates[:, 3 * H:4 * H])
            c = f_g * c + i_g * g_g
            h = o_g * jnp.tanh(c)
            ys.append(h)
        layer_in = jnp.stack(ys, axis=0)
        h_finals.append(h)
    hn = jnp.concatenate(h_finals, axis=0)
    z = jnp.maximum(hn, 0.0) @ raw["fc1_w"].T + raw["fc1_b"]
    z = jnp.maximum(z, 0.0)
    return z @ raw["fc2_w"].T + raw["fc2_b"]


# --------------------------- parameter creation ------------------------------

def init_params(key, input_size, hidden_size, num_layers, n_steps_out):
    """PyTorch-layout params with uniform(-1/sqrt(H), 1/sqrt(H)) init."""
    H = hidden_size
    k_lstm = 1.0 / jnp.sqrt(jnp.float32(H))
    layers = []
    for l in range(num_layers):
        d_in = input_size if l == 0 else H
        key, k1, k2, k3, k4 = jax.random.split(key, 5)
        w_ih = jax.random.uniform(k1, (4 * H, d_in), jnp.float32, -k_lstm, k_lstm)
        w_hh = jax.random.uniform(k2, (4 * H, H), jnp.float32, -k_lstm, k_lstm)
        b_ih = jax.random.uniform(k3, (4 * H,), jnp.float32, -k_lstm, k_lstm)
        b_hh = jax.random.uniform(k4, (4 * H,), jnp.float32, -k_lstm, k_lstm)
        layers.append((w_ih, w_hh, b_ih, b_hh))

    key, k5, k6, k7, k8 = jax.random.split(key, 5)
    k_fc1 = 1.0 / jnp.sqrt(jnp.float32(H))
    fc1_w = jax.random.uniform(k5, (128, H), jnp.float32, -k_fc1, k_fc1)
    fc1_b = jax.random.uniform(k6, (128,), jnp.float32, -k_fc1, k_fc1)
    k_fc2 = 1.0 / jnp.sqrt(jnp.float32(128))
    fc2_w = jax.random.uniform(k7, (n_steps_out, 128), jnp.float32, -k_fc2, k_fc2)
    fc2_b = jax.random.uniform(k8, (n_steps_out,), jnp.float32, -k_fc2, k_fc2)

    return {"layers": layers, "fc1_w": fc1_w, "fc1_b": fc1_b,
            "fc2_w": fc2_w, "fc2_b": fc2_b}


# ----------------------------------- main ------------------------------------

if __name__ == "__main__":
    # Small shapes consistent with the module.
    batch, seq_len = 2, 8
    input_size, hidden_size, num_layers, n_steps_out = 4, 32, 2, 3

    key = jax.random.PRNGKey(0)
    key, xk = jax.random.split(key)
    x = jax.random.normal(xk, (batch, seq_len, input_size), jnp.float32)

    params = init_params(key, input_size, hidden_size, num_layers, n_steps_out)

    out = sentiment_price_lstm_forward(x, params)
    out = jax.block_until_ready(out)
    assert out.shape == (num_layers * batch, n_steps_out), out.shape

    # Correctness check against an f32 pure-JAX reference.  The kernel uses bf16
    # matmul operands with f32 accumulation (typical max-abs error ~1e-2 here).
    ref = jax.block_until_ready(_reference_forward(x, params))
    max_err = float(jnp.max(jnp.abs(out - ref)))
    assert max_err < 3e-2, f"mismatch vs reference, max abs err = {max_err}"

    print("KERNEL_OK")
</pallas_src>

<mosaic_0001>
module attributes {stable_mosaic.version = 11 : i64} {
  func.func @kernel(%arg0: memref<64x4xf32, #tpu.memory_space<vmem>>, %arg1: memref<4x128xbf16, #tpu.memory_space<vmem>>, %arg2: memref<32x128xbf16, #tpu.memory_space<vmem>>, %arg3: memref<1x128xf32, #tpu.memory_space<vmem>>, %arg4: memref<64x128xbf16, #tpu.memory_space<vmem>>, %arg5: memref<1x128xf32, #tpu.memory_space<vmem>>, %arg6: memref<32x128xbf16, #tpu.memory_space<vmem>>, %arg7: memref<1x128xf32, #tpu.memory_space<vmem>>, %arg8: memref<128x3xbf16, #tpu.memory_space<vmem>>, %arg9: memref<1x3xf32, #tpu.memory_space<vmem>>, %arg10: memref<16x3xf32, #tpu.memory_space<vmem>>) attributes {dimension_semantics = [], scalar_prefetch = 0 : i64, scratch_operands = 0 : i64, tpu.core_type = #tpu.core_type<tc>} {
    %c0 = arith.constant 0 : index
    %c0_0 = arith.constant 0 : index
    %0 = vector.load %arg0[%c0, %c0_0] : memref<64x4xf32, #tpu.memory_space<vmem>>, vector<64x4xf32>
    %1 = arith.truncf %0 : vector<64x4xf32> to vector<64x4xbf16>
    %c0_1 = arith.constant 0 : index
    %c0_2 = arith.constant 0 : index
    %2 = vector.load %arg1[%c0_1, %c0_2] : memref<4x128xbf16, #tpu.memory_space<vmem>>, vector<4x128xbf16>
    %cst = arith.constant dense<0.000000e+00> : vector<64x128xf32>
    %3 = tpu.matmul %1, %2, %cst {dimension_numbers = #tpu.dot_dimension_numbers<[1], [0], [0], [1], [0, 0, 1, 1], [], []>} : vector<64x4xbf16>, vector<4x128xbf16>, vector<64x128xf32> -> vector<64x128xf32>
    %c0_3 = arith.constant 0 : index
    %c0_4 = arith.constant 0 : index
    %4 = vector.load %arg3[%c0_3, %c0_4] : memref<1x128xf32, #tpu.memory_space<vmem>>, vector<1x128xf32>
    %5 = vector.broadcast %4 : vector<1x128xf32> to vector<64x128xf32>
    %6 = arith.addf %3, %5 : vector<64x128xf32>
    %c0_5 = arith.constant 0 : index
    %c0_6 = arith.constant 0 : index
    %7 = vector.load %arg2[%c0_5, %c0_6] : memref<32x128xbf16, #tpu.memory_space<vmem>>, vector<32x128xbf16>
    %c0_7 = arith.constant 0 : index
    %c0_8 = arith.constant 0 : index
    %8 = vector.load %arg4[%c0_7, %c0_8] : memref<64x128xbf16, #tpu.memory_space<vmem>>, vector<64x128xbf16>
    %c0_9 = arith.constant 0 : index
    %c0_10 = arith.constant 0 : index
    %9 = vector.load %arg5[%c0_9, %c0_10] : memref<1x128xf32, #tpu.memory_space<vmem>>, vector<1x128xf32>
    %10 = vector.shape_cast %9 : vector<1x128xf32> to vector<1x128xf32>
    %11 = vector.broadcast %10 : vector<1x128xf32> to vector<8x128xf32>
    %cst_11 = arith.constant 0.000000e+00 : f32
    %12 = vector.broadcast %cst_11 : f32 to vector<8x32xf32>
    %cst_12 = arith.constant 0.000000e+00 : f32
    %13 = vector.broadcast %cst_12 : f32 to vector<8x32xf32>
    %cst_13 = arith.constant 0.000000e+00 : f32
    %14 = vector.broadcast %cst_13 : f32 to vector<8x32xf32>
    %cst_14 = arith.constant 0.000000e+00 : f32
    %15 = vector.broadcast %cst_14 : f32 to vector<8x32xf32>
    %16 = vector.extract_strided_slice %6 {offsets = [0, 0], sizes = [8, 128], strides = [1, 1]} : vector<64x128xf32> to vector<8x128xf32>
    %17 = arith.truncf %12 : vector<8x32xf32> to vector<8x32xbf16>
    %cst_15 = arith.constant dense<0.000000e+00> : vector<8x128xf32>
    %18 = tpu.matmul %17, %7, %cst_15 {dimension_numbers = #tpu.dot_dimension_numbers<[1], [0], [0], [1], [0, 0, 1, 1], [], []>} : vector<8x32xbf16>, vector<32x128xbf16>, vector<8x128xf32> -> vector<8x128xf32>
    %19 = arith.addf %16, %18 : vector<8x128xf32>
    %cst_16 = arith.constant 5.000000e-01 : f32
    %20 = vector.broadcast %cst_16 : f32 to vector<8x128xf32>
    %21 = arith.mulf %19, %20 : vector<8x128xf32>
    %22 = math.tanh %21 : vector<8x128xf32>
    %cst_17 = arith.constant 1.000000e+00 : f32
    %23 = vector.broadcast %cst_17 : f32 to vector<8x128xf32>
    %24 = arith.addf %22, %23 : vector<8x128xf32>
    %cst_18 = arith.constant 5.000000e-01 : f32
    %25 = vector.broadcast %cst_18 : f32 to vector<8x128xf32>
    %26 = arith.mulf %25, %24 : vector<8x128xf32>
    %27 = math.tanh %19 : vector<8x128xf32>
    %28 = vector.extract_strided_slice %26 {offsets = [0, 0], sizes = [8, 32], strides = [1, 1]} : vector<8x128xf32> to vector<8x32xf32>
    %29 = vector.extract_strided_slice %26 {offsets = [0, 32], sizes = [8, 32], strides = [1, 1]} : vector<8x128xf32> to vector<8x32xf32>
    %30 = vector.extract_strided_slice %27 {offsets = [0, 64], sizes = [8, 32], strides = [1, 1]} : vector<8x128xf32> to vector<8x32xf32>
    %31 = vector.extract_strided_slice %26 {offsets = [0, 96], sizes = [8, 32], strides = [1, 1]} : vector<8x128xf32> to vector<8x32xf32>
    %32 = arith.mulf %29, %14 : vector<8x32xf32>
    %33 = arith.mulf %28, %30 : vector<8x32xf32>
    %34 = arith.addf %32, %33 : vector<8x32xf32>
    %35 = math.tanh %34 : vector<8x32xf32>
    %36 = arith.mulf %31, %35 : vector<8x32xf32>
    %37 = tpu.concatenate %36, %13 in 1 : vector<8x32xf32>, vector<8x32xf32> -> vector<8x64xf32>
    %38 = arith.truncf %37 : vector<8x64xf32> to vector<8x64xbf16>
    %cst_19 = arith.constant dense<0.000000e+00> : vector<8x128xf32>
    %39 = tpu.matmul %38, %8, %cst_19 {dimension_numbers = #tpu.dot_dimension_numbers<[1], [0], [0], [1], [0, 0, 1, 1], [], []>} : vector<8x64xbf16>, vector<64x128xbf16>, vector<8x128xf32> -> vector<8x128xf32>
    %40 = arith.addf %39, %11 : vector<8x128xf32>
    %cst_20 = arith.constant 5.000000e-01 : f32
    %41 = vector.broadcast %cst_20 : f32 to vector<8x128xf32>
    %42 = arith.mulf %40, %41 : vector<8x128xf32>
    %43 = math.tanh %42 : vector<8x128xf32>
    %cst_21 = arith.constant 1.000000e+00 : f32
    %44 = vector.broadcast %cst_21 : f32 to vector<8x128xf32>
    %45 = arith.addf %43, %44 : vector<8x128xf32>
    %cst_22 = arith.constant 5.000000e-01 : f32
    %46 = vector.broadcast %cst_22 : f32 to vector<8x128xf32>
    %47 = arith.mulf %46, %45 : vector<8x128xf32>
    %48 = math.tanh %40 : vector<8x128xf32>
    %49 = vector.extract_strided_slice %47 {offsets = [0, 0], sizes = [8, 32], strides = [1, 1]} : vector<8x128xf32> to vector<8x32xf32>
    %50 = vector.extract_strided_slice %47 {offsets = [0, 32], sizes = [8, 32], strides = [1, 1]} : vector<8x128xf32> to vector<8x32xf32>
    %51 = vector.extract_strided_slice %48 {offsets = [0, 64], sizes = [8, 32], strides = [1, 1]} : vector<8x128xf32> to vector<8x32xf32>
    %52 = vector.extract_strided_slice %47 {offsets = [0, 96], sizes = [8, 32], strides = [1, 1]} : vector<8x128xf32> to vector<8x32xf32>
    %53 = arith.mulf %50, %15 : vector<8x32xf32>
    %54 = arith.mulf %49, %51 : vector<8x32xf32>
    %55 = arith.addf %53, %54 : vector<8x32xf32>
    %56 = math.tanh %55 : vector<8x32xf32>
    %57 = arith.mulf %52, %56 : vector<8x32xf32>
    %58 = vector.extract_strided_slice %6 {offsets = [8, 0], sizes = [8, 128], strides = [1, 1]} : vector<64x128xf32> to vector<8x128xf32>
    %59 = arith.truncf %36 : vector<8x32xf32> to vector<8x32xbf16>
    %cst_23 = arith.constant dense<0.000000e+00> : vector<8x128xf32>
    %60 = tpu.matmul %59, %7, %cst_23 {dimension_numbers = #tpu.dot_dimension_numbers<[1], [0], [0], [1], [0, 0, 1, 1], [], []>} : vector<8x32xbf16>, vector<32x128xbf16>, vector<8x128xf32> -> vector<8x128xf32>
    %61 = arith.addf %58, %60 : vector<8x128xf32>
    %cst_24 = arith.constant 5.000000e-01 : f32
    %62 = vector.broadcast %cst_24 : f32 to vector<8x128xf32>
    %63 = arith.mulf %61, %62 : vector<8x128xf32>
    %64 = math.tanh %63 : vector<8x128xf32>
    %cst_25 = arith.constant 1.000000e+00 : f32
    %65 = vector.broadcast %cst_25 : f32 to vector<8x128xf32>
    %66 = arith.addf %64, %65 : vector<8x128xf32>
    %cst_26 = arith.constant 5.000000e-01 : f32
    %67 = vector.broadcast %cst_26 : f32 to vector<8x128xf32>
    %68 = arith.mulf %67, %66 : vector<8x128xf32>
    %69 = math.tanh %61 : vector<8x128xf32>
    %70 = vector.extract_strided_slice %68 {offsets = [0, 0], sizes = [8, 32], strides = [1, 1]} : vector<8x128xf32> to vector<8x32xf32>
    %71 = vector.extract_strided_slice %68 {offsets = [0, 32], sizes = [8, 32], strides = [1, 1]} : vector<8x128xf32> to vector<8x32xf32>
    %72 = vector.extract_strided_slice %69 {offsets = [0, 64], sizes = [8, 32], strides = [1, 1]} : vector<8x128xf32> to vector<8x32xf32>
    %73 = vector.extract_strided_slice %68 {offsets = [0, 96], sizes = [8, 32], strides = [1, 1]} : vector<8x128xf32> to vector<8x32xf32>
    %74 = arith.mulf %71, %34 : vector<8x32xf32>
    %75 = arith.mulf %70, %72 : vector<8x32xf32>
    %76 = arith.addf %74, %75 : vector<8x32xf32>
    %77 = math.tanh %76 : vector<8x32xf32>
    %78 = arith.mulf %73, %77 : vector<8x32xf32>
    %79 = tpu.concatenate %78, %57 in 1 : vector<8x32xf32>, vector<8x32xf32> -> vector<8x64xf32>
    %80 = arith.truncf %79 : vector<8x64xf32> to vector<8x64xbf16>
    %cst_27 = arith.constant dense<0.000000e+00> : vector<8x128xf32>
    %81 = tpu.matmul %80, %8, %cst_27 {dimension_numbers = #tpu.dot_dimension_numbers<[1], [0], [0], [1], [0, 0, 1, 1], [], []>} : vector<8x64xbf16>, vector<64x128xbf16>, vector<8x128xf32> -> vector<8x128xf32>
    %82 = arith.addf %81, %11 : vector<8x128xf32>
    %cst_28 = arith.constant 5.000000e-01 : f32
    %83 = vector.broadcast %cst_28 : f32 to vector<8x128xf32>
    %84 = arith.mulf %82, %83 : vector<8x128xf32>
    %85 = math.tanh %84 : vector<8x128xf32>
    %cst_29 = arith.constant 1.000000e+00 : f32
    %86 = vector.broadcast %cst_29 : f32 to vector<8x128xf32>
    %87 = arith.addf %85, %86 : vector<8x128xf32>
    %cst_30 = arith.constant 5.000000e-01 : f32
    %88 = vector.broadcast %cst_30 : f32 to vector<8x128xf32>
    %89 = arith.mulf %88, %87 : vector<8x128xf32>
    %90 = math.tanh %82 : vector<8x128xf32>
    %91 = vector.extract_strided_slice %89 {offsets = [0, 0], sizes = [8, 32], strides = [1, 1]} : vector<8x128xf32> to vector<8x32xf32>
    %92 = vector.extract_strided_slice %89 {offsets = [0, 32], sizes = [8, 32], strides = [1, 1]} : vector<8x128xf32> to vector<8x32xf32>
    %93 = vector.extract_strided_slice %90 {offsets = [0, 64], sizes = [8, 32], strides = [1, 1]} : vector<8x128xf32> to vector<8x32xf32>
    %94 = vector.extract_strided_slice %89 {offsets = [0, 96], sizes = [8, 32], strides = [1, 1]} : vector<8x128xf32> to vector<8x32xf32>
    %95 = arith.mulf %92, %55 : vector<8x32xf32>
    %96 = arith.mulf %91, %93 : vector<8x32xf32>
    %97 = arith.addf %95, %96 : vector<8x32xf32>
    %98 = math.tanh %97 : vector<8x32xf32>
    %99 = arith.mulf %94, %98 : vector<8x32xf32>
    %100 = vector.extract_strided_slice %6 {offsets = [16, 0], sizes = [8, 128], strides = [1, 1]} : vector<64x128xf32> to vector<8x128xf32>
    %101 = arith.truncf %78 : vector<8x32xf32> to vector<8x32xbf16>
    %cst_31 = arith.constant dense<0.000000e+00> : vector<8x128xf32>
    %102 = tpu.matmul %101, %7, %cst_31 {dimension_numbers = #tpu.dot_dimension_numbers<[1], [0], [0], [1], [0, 0, 1, 1], [], []>} : vector<8x32xbf16>, vector<32x128xbf16>, vector<8x128xf32> -> vector<8x128xf32>
    %103 = arith.addf %100, %102 : vector<8x128xf32>
    %cst_32 = arith.constant 5.000000e-01 : f32
    %104 = vector.broadcast %cst_32 : f32 to vector<8x128xf32>
    %105 = arith.mulf %103, %104 : vector<8x128xf32>
    %106 = math.tanh %105 : vector<8x128xf32>
    %cst_33 = arith.constant 1.000000e+00 : f32
    %107 = vector.broadcast %cst_33 : f32 to vector<8x128xf32>
    %108 = arith.addf %106, %107 : vector<8x128xf32>
    %cst_34 = arith.constant 5.000000e-01 : f32
    %109 = vector.broadcast %cst_34 : f32 to vector<8x128xf32>
    %110 = arith.mulf %109, %108 : vector<8x128xf32>
    %111 = math.tanh %103 : vector<8x128xf32>
    %112 = vector.extract_strided_slice %110 {offsets = [0, 0], sizes = [8, 32], strides = [1, 1]} : vector<8x128xf32> to vector<8x32xf32>
    %113 = vector.extract_strided_slice %110 {offsets = [0, 32], sizes = [8, 32], strides = [1, 1]} : vector<8x128xf32> to vector<8x32xf32>
    %114 = vector.extract_strided_slice %111 {offsets = [0, 64], sizes = [8, 32], strides = [1, 1]} : vector<8x128xf32> to vector<8x32xf32>
    %115 = vector.extract_strided_slice %110 {offsets = [0, 96], sizes = [8, 32], strides = [1, 1]} : vector<8x128xf32> to vector<8x32xf32>
    %116 = arith.mulf %113, %76 : vector<8x32xf32>
    %117 = arith.mulf %112, %114 : vector<8x32xf32>
    %118 = arith.addf %116, %117 : vector<8x32xf32>
    %119 = math.tanh %118 : vector<8x32xf32>
    %120 = arith.mulf %115, %119 : vector<8x32xf32>
    %121 = tpu.concatenate %120, %99 in 1 : vector<8x32xf32>, vector<8x32xf32> -> vector<8x64xf32>
    %122 = arith.truncf %121 : vector<8x64xf32> to vector<8x64xbf16>
    %cst_35 = arith.constant dense<0.000000e+00> : vector<8x128xf32>
    %123 = tpu.matmul %122, %8, %cst_35 {dimension_numbers = #tpu.dot_dimension_numbers<[1], [0], [0], [1], [0, 0, 1, 1], [], []>} : vector<8x64xbf16>, vector<64x128xbf16>, vector<8x128xf32> -> vector<8x128xf32>
    %124 = arith.addf %123, %11 : vector<8x128xf32>
    %cst_36 = arith.constant 5.000000e-01 : f32
    %125 = vector.broadcast %cst_36 : f32 to vector<8x128xf32>
    %126 = arith.mulf %124, %125 : vector<8x128xf32>
    %127 = math.tanh %126 : vector<8x128xf32>
    %cst_37 = arith.constant 1.000000e+00 : f32
    %128 = vector.broadcast %cst_37 : f32 to vector<8x128xf32>
    %129 = arith.addf %127, %128 : vector<8x128xf32>
    %cst_38 = arith.constant 5.000000e-01 : f32
    %130 = vector.broadcast %cst_38 : f32 to vector<8x128xf32>
    %131 = arith.mulf %130, %129 : vector<8x128xf32>
    %132 = math.tanh %124 : vector<8x128xf32>
    %133 = vector.extract_strided_slice %131 {offsets = [0, 0], sizes = [8, 32], strides = [1, 1]} : vector<8x128xf32> to vector<8x32xf32>
    %134 = vector.extract_strided_slice %131 {offsets = [0, 32], sizes = [8, 32], strides = [1, 1]} : vector<8x128xf32> to vector<8x32xf32>
    %135 = vector.extract_strided_slice %132 {offsets = [0, 64], sizes = [8, 32], strides = [1, 1]} : vector<8x128xf32> to vector<8x32xf32>
    %136 = vector.extract_strided_slice %131 {offsets = [0, 96], sizes = [8, 32], strides = [1, 1]} : vector<8x128xf32> to vector<8x32xf32>
    %137 = arith.mulf %134, %97 : vector<8x32xf32>
    %138 = arith.mulf %133, %135 : vector<8x32xf32>
    %139 = arith.addf %137, %138 : vector<8x32xf32>
    %140 = math.tanh %139 : vector<8x32xf32>
    %141 = arith.mulf %136, %140 : vector<8x32xf32>
    %142 = vector.extract_strided_slice %6 {offsets = [24, 0], sizes = [8, 128], strides = [1, 1]} : vector<64x128xf32> to vector<8x128xf32>
    %143 = arith.truncf %120 : vector<8x32xf32> to vector<8x32xbf16>
    %cst_39 = arith.constant dense<0.000000e+00> : vector<8x128xf32>
    %144 = tpu.matmul %143, %7, %cst_39 {dimension_numbers = #tpu.dot_dimension_numbers<[1], [0], [0], [1], [0, 0, 1, 1], [], []>} : vector<8x32xbf16>, vector<32x128xbf16>, vector<8x128xf32> -> vector<8x128xf32>
    %145 = arith.addf %142, %144 : vector<8x128xf32>
    %cst_40 = arith.constant 5.000000e-01 : f32
    %146 = vector.broadcast %cst_40 : f32 to vector<8x128xf32>
    %147 = arith.mulf %145, %146 : vector<8x128xf32>
    %148 = math.tanh %147 : vector<8x128xf32>
    %cst_41 = arith.constant 1.000000e+00 : f32
    %149 = vector.broadcast %cst_41 : f32 to vector<8x128xf32>
    %150 = arith.addf %148, %149 : vector<8x128xf32>
    %cst_42 = arith.constant 5.000000e-01 : f32
    %151 = vector.broadcast %cst_42 : f32 to vector<8x128xf32>
    %152 = arith.mulf %151, %150 : vector<8x128xf32>
    %153 = math.tanh %145 : vector<8x128xf32>
    %154 = vector.extract_strided_slice %152 {offsets = [0, 0], sizes = [8, 32], strides = [1, 1]} : vector<8x128xf32> to vector<8x32xf32>
    %155 = vector.extract_strided_slice %152 {offsets = [0, 32], sizes = [8, 32], strides = [1, 1]} : vector<8x128xf32> to vector<8x32xf32>
    %156 = vector.extract_strided_slice %153 {offsets = [0, 64], sizes = [8, 32], strides = [1, 1]} : vector<8x128xf32> to vector<8x32xf32>
    %157 = vector.extract_strided_slice %152 {offsets = [0, 96], sizes = [8, 32], strides = [1, 1]} : vector<8x128xf32> to vector<8x32xf32>
    %158 = arith.mulf %155, %118 : vector<8x32xf32>
    %159 = arith.mulf %154, %156 : vector<8x32xf32>
    %160 = arith.addf %158, %159 : vector<8x32xf32>
    %161 = math.tanh %160 : vector<8x32xf32>
    %162 = arith.mulf %157, %161 : vector<8x32xf32>
    %163 = tpu.concatenate %162, %141 in 1 : vector<8x32xf32>, vector<8x32xf32> -> vector<8x64xf32>
    %164 = arith.truncf %163 : vector<8x64xf32> to vector<8x64xbf16>
    %cst_43 = arith.constant dense<0.000000e+00> : vector<8x128xf32>
    %165 = tpu.matmul %164, %8, %cst_43 {dimension_numbers = #tpu.dot_dimension_numbers<[1], [0], [0], [1], [0, 0, 1, 1], [], []>} : vector<8x64xbf16>, vector<64x128xbf16>, vector<8x128xf32> -> vector<8x128xf32>
    %166 = arith.addf %165, %11 : vector<8x128xf32>
    %cst_44 = arith.constant 5.000000e-01 : f32
    %167 = vector.broadcast %cst_44 : f32 to vector<8x128xf32>
    %168 = arith.mulf %166, %167 : vector<8x128xf32>
    %169 = math.tanh %168 : vector<8x128xf32>
    %cst_45 = arith.constant 1.000000e+00 : f32
    %170 = vector.broadcast %cst_45 : f32 to vector<8x128xf32>
    %171 = arith.addf %169, %170 : vector<8x128xf32>
    %cst_46 = arith.constant 5.000000e-01 : f32
    %172 = vector.broadcast %cst_46 : f32 to vector<8x128xf32>
    %173 = arith.mulf %172, %171 : vector<8x128xf32>
    %174 = math.tanh %166 : vector<8x128xf32>
    %175 = vector.extract_strided_slice %173 {offsets = [0, 0], sizes = [8, 32], strides = [1, 1]} : vector<8x128xf32> to vector<8x32xf32>
    %176 = vector.extract_strided_slice %173 {offsets = [0, 32], sizes = [8, 32], strides = [1, 1]} : vector<8x128xf32> to vector<8x32xf32>
    %177 = vector.extract_strided_slice %174 {offsets = [0, 64], sizes = [8, 32], strides = [1, 1]} : vector<8x128xf32> to vector<8x32xf32>
    %178 = vector.extract_strided_slice %173 {offsets = [0, 96], sizes = [8, 32], strides = [1, 1]} : vector<8x128xf32> to vector<8x32xf32>
    %179 = arith.mulf %176, %139 : vector<8x32xf32>
    %180 = arith.mulf %175, %177 : vector<8x32xf32>
    %181 = arith.addf %179, %180 : vector<8x32xf32>
    %182 = math.tanh %181 : vector<8x32xf32>
    %183 = arith.mulf %178, %182 : vector<8x32xf32>
    %184 = vector.extract_strided_slice %6 {offsets = [32, 0], sizes = [8, 128], strides = [1, 1]} : vector<64x128xf32> to vector<8x128xf32>
    %185 = arith.truncf %162 : vector<8x32xf32> to vector<8x32xbf16>
    %cst_47 = arith.constant dense<0.000000e+00> : vector<8x128xf32>
    %186 = tpu.matmul %185, %7, %cst_47 {dimension_numbers = #tpu.dot_dimension_numbers<[1], [0], [0], [1], [0, 0, 1, 1], [], []>} : vector<8x32xbf16>, vector<32x128xbf16>, vector<8x128xf32> -> vector<8x128xf32>
    %187 = arith.addf %184, %186 : vector<8x128xf32>
    %cst_48 = arith.constant 5.000000e-01 : f32
    %188 = vector.broadcast %cst_48 : f32 to vector<8x128xf32>
    %189 = arith.mulf %187, %188 : vector<8x128xf32>
    %190 = math.tanh %189 : vector<8x128xf32>
    %cst_49 = arith.constant 1.000000e+00 : f32
    %191 = vector.broadcast %cst_49 : f32 to vector<8x128xf32>
    %192 = arith.addf %190, %191 : vector<8x128xf32>
    %cst_50 = arith.constant 5.000000e-01 : f32
    %193 = vector.broadcast %cst_50 : f32 to vector<8x128xf32>
    %194 = arith.mulf %193, %192 : vector<8x128xf32>
    %195 = math.tanh %187 : vector<8x128xf32>
    %196 = vector.extract_strided_slice %194 {offsets = [0, 0], sizes = [8, 32], strides = [1, 1]} : vector<8x128xf32> to vector<8x32xf32>
    %197 = vector.extract_strided_slice %194 {offsets = [0, 32], sizes = [8, 32], strides = [1, 1]} : vector<8x128xf32> to vector<8x32xf32>
    %198 = vector.extract_strided_slice %195 {offsets = [0, 64], sizes = [8, 32], strides = [1, 1]} : vector<8x128xf32> to vector<8x32xf32>
    %199 = vector.extract_strided_slice %194 {offsets = [0, 96], sizes = [8, 32], strides = [1, 1]} : vector<8x128xf32> to vector<8x32xf32>
    %200 = arith.mulf %197, %160 : vector<8x32xf32>
    %201 = arith.mulf %196, %198 : vector<8x32xf32>
    %202 = arith.addf %200, %201 : vector<8x32xf32>
    %203 = math.tanh %202 : vector<8x32xf32>
    %204 = arith.mulf %199, %203 : vector<8x32xf32>
    %205 = tpu.concatenate %204, %183 in 1 : vector<8x32xf32>, vector<8x32xf32> -> vector<8x64xf32>
    %206 = arith.truncf %205 : vector<8x64xf32> to vector<8x64xbf16>
    %cst_51 = arith.constant dense<0.000000e+00> : vector<8x128xf32>
    %207 = tpu.matmul %206, %8, %cst_51 {dimension_numbers = #tpu.dot_dimension_numbers<[1], [0], [0], [1], [0, 0, 1, 1], [], []>} : vector<8x64xbf16>, vector<64x128xbf16>, vector<8x128xf32> -> vector<8x128xf32>
    %208 = arith.addf %207, %11 : vector<8x128xf32>
    %cst_52 = arith.constant 5.000000e-01 : f32
    %209 = vector.broadcast %cst_52 : f32 to vector<8x128xf32>
    %210 = arith.mulf %208, %209 : vector<8x128xf32>
    %211 = math.tanh %210 : vector<8x128xf32>
    %cst_53 = arith.constant 1.000000e+00 : f32
    %212 = vector.broadcast %cst_53 : f32 to vector<8x128xf32>
    %213 = arith.addf %211, %212 : vector<8x128xf32>
    %cst_54 = arith.constant 5.000000e-01 : f32
    %214 = vector.broadcast %cst_54 : f32 to vector<8x128xf32>
    %215 = arith.mulf %214, %213 : vector<8x128xf32>
    %216 = math.tanh %208 : vector<8x128xf32>
    %217 = vector.extract_strided_slice %215 {offsets = [0, 0], sizes = [8, 32], strides = [1, 1]} : vector<8x128xf32> to vector<8x32xf32>
    %218 = vector.extract_strided_slice %215 {offsets = [0, 32], sizes = [8, 32], strides = [1, 1]} : vector<8x128xf32> to vector<8x32xf32>
    %219 = vector.extract_strided_slice %216 {offsets = [0, 64], sizes = [8, 32], strides = [1, 1]} : vector<8x128xf32> to vector<8x32xf32>
    %220 = vector.extract_strided_slice %215 {offsets = [0, 96], sizes = [8, 32], strides = [1, 1]} : vector<8x128xf32> to vector<8x32xf32>
    %221 = arith.mulf %218, %181 : vector<8x32xf32>
    %222 = arith.mulf %217, %219 : vector<8x32xf32>
    %223 = arith.addf %221, %222 : vector<8x32xf32>
    %224 = math.tanh %223 : vector<8x32xf32>
    %225 = arith.mulf %220, %224 : vector<8x32xf32>
    %226 = vector.extract_strided_slice %6 {offsets = [40, 0], sizes = [8, 128], strides = [1, 1]} : vector<64x128xf32> to vector<8x128xf32>
    %227 = arith.truncf %204 : vector<8x32xf32> to vector<8x32xbf16>
    %cst_55 = arith.constant dense<0.000000e+00> : vector<8x128xf32>
    %228 = tpu.matmul %227, %7, %cst_55 {dimension_numbers = #tpu.dot_dimension_numbers<[1], [0], [0], [1], [0, 0, 1, 1], [], []>} : vector<8x32xbf16>, vector<32x128xbf16>, vector<8x128xf32> -> vector<8x128xf32>
    %229 = arith.addf %226, %228 : vector<8x128xf32>
    %cst_56 = arith.constant 5.000000e-01 : f32
    %230 = vector.broadcast %cst_56 : f32 to vector<8x128xf32>
    %231 = arith.mulf %229, %230 : vector<8x128xf32>
    %232 = math.tanh %231 : vector<8x128xf32>
    %cst_57 = arith.constant 1.000000e+00 : f32
    %233 = vector.broadcast %cst_57 : f32 to vector<8x128xf32>
    %234 = arith.addf %232, %233 : vector<8x128xf32>
    %cst_58 = arith.constant 5.000000e-01 : f32
    %235 = vector.broadcast %cst_58 : f32 to vector<8x128xf32>
    %236 = arith.mulf %235, %234 : vector<8x128xf32>
    %237 = math.tanh %229 : vector<8x128xf32>
    %238 = vector.extract_strided_slice %236 {offsets = [0, 0], sizes = [8, 32], strides = [1, 1]} : vector<8x128xf32> to vector<8x32xf32>
    %239 = vector.extract_strided_slice %236 {offsets = [0, 32], sizes = [8, 32], strides = [1, 1]} : vector<8x128xf32> to vector<8x32xf32>
    %240 = vector.extract_strided_slice %237 {offsets = [0, 64], sizes = [8, 32], strides = [1, 1]} : vector<8x128xf32> to vector<8x32xf32>
    %241 = vector.extract_strided_slice %236 {offsets = [0, 96], sizes = [8, 32], strides = [1, 1]} : vector<8x128xf32> to vector<8x32xf32>
    %242 = arith.mulf %239, %202 : vector<8x32xf32>
    %243 = arith.mulf %238, %240 : vector<8x32xf32>
    %244 = arith.addf %242, %243 : vector<8x32xf32>
    %245 = math.tanh %244 : vector<8x32xf32>
    %246 = arith.mulf %241, %245 : vector<8x32xf32>
    %247 = tpu.concatenate %246, %225 in 1 : vector<8x32xf32>, vector<8x32xf32> -> vector<8x64xf32>
    %248 = arith.truncf %247 : vector<8x64xf32> to vector<8x64xbf16>
    %cst_59 = arith.constant dense<0.000000e+00> : vector<8x128xf32>
    %249 = tpu.matmul %248, %8, %cst_59 {dimension_numbers = #tpu.dot_dimension_numbers<[1], [0], [0], [1], [0, 0, 1, 1], [], []>} : vector<8x64xbf16>, vector<64x128xbf16>, vector<8x128xf32> -> vector<8x128xf32>
    %250 = arith.addf %249, %11 : vector<8x128xf32>
    %cst_60 = arith.constant 5.000000e-01 : f32
    %251 = vector.broadcast %cst_60 : f32 to vector<8x128xf32>
    %252 = arith.mulf %250, %251 : vector<8x128xf32>
    %253 = math.tanh %252 : vector<8x128xf32>
    %cst_61 = arith.constant 1.000000e+00 : f32
    %254 = vector.broadcast %cst_61 : f32 to vector<8x128xf32>
    %255 = arith.addf %253, %254 : vector<8x128xf32>
    %cst_62 = arith.constant 5.000000e-01 : f32
    %256 = vector.broadcast %cst_62 : f32 to vector<8x128xf32>
    %257 = arith.mulf %256, %255 : vector<8x128xf32>
    %258 = math.tanh %250 : vector<8x128xf32>
    %259 = vector.extract_strided_slice %257 {offsets = [0, 0], sizes = [8, 32], strides = [1, 1]} : vector<8x128xf32> to vector<8x32xf32>
    %260 = vector.extract_strided_slice %257 {offsets = [0, 32], sizes = [8, 32], strides = [1, 1]} : vector<8x128xf32> to vector<8x32xf32>
    %261 = vector.extract_strided_slice %258 {offsets = [0, 64], sizes = [8, 32], strides = [1, 1]} : vector<8x128xf32> to vector<8x32xf32>
    %262 = vector.extract_strided_slice %257 {offsets = [0, 96], sizes = [8, 32], strides = [1, 1]} : vector<8x128xf32> to vector<8x32xf32>
    %263 = arith.mulf %260, %223 : vector<8x32xf32>
    %264 = arith.mulf %259, %261 : vector<8x32xf32>
    %265 = arith.addf %263, %264 : vector<8x32xf32>
    %266 = math.tanh %265 : vector<8x32xf32>
    %267 = arith.mulf %262, %266 : vector<8x32xf32>
    %268 = vector.extract_strided_slice %6 {offsets = [48, 0], sizes = [8, 128], strides = [1, 1]} : vector<64x128xf32> to vector<8x128xf32>
    %269 = arith.truncf %246 : vector<8x32xf32> to vector<8x32xbf16>
    %cst_63 = arith.constant dense<0.000000e+00> : vector<8x128xf32>
    %270 = tpu.matmul %269, %7, %cst_63 {dimension_numbers = #tpu.dot_dimension_numbers<[1], [0], [0], [1], [0, 0, 1, 1], [], []>} : vector<8x32xbf16>, vector<32x128xbf16>, vector<8x128xf32> -> vector<8x128xf32>
    %271 = arith.addf %268, %270 : vector<8x128xf32>
    %cst_64 = arith.constant 5.000000e-01 : f32
    %272 = vector.broadcast %cst_64 : f32 to vector<8x128xf32>
    %273 = arith.mulf %271, %272 : vector<8x128xf32>
    %274 = math.tanh %273 : vector<8x128xf32>
    %cst_65 = arith.constant 1.000000e+00 : f32
    %275 = vector.broadcast %cst_65 : f32 to vector<8x128xf32>
    %276 = arith.addf %274, %275 : vector<8x128xf32>
    %cst_66 = arith.constant 5.000000e-01 : f32
    %277 = vector.broadcast %cst_66 : f32 to vector<8x128xf32>
    %278 = arith.mulf %277, %276 : vector<8x128xf32>
    %279 = math.tanh %271 : vector<8x128xf32>
    %280 = vector.extract_strided_slice %278 {offsets = [0, 0], sizes = [8, 32], strides = [1, 1]} : vector<8x128xf32> to vector<8x32xf32>
    %281 = vector.extract_strided_slice %278 {offsets = [0, 32], sizes = [8, 32], strides = [1, 1]} : vector<8x128xf32> to vector<8x32xf32>
    %282 = vector.extract_strided_slice %279 {offsets = [0, 64], sizes = [8, 32], strides = [1, 1]} : vector<8x128xf32> to vector<8x32xf32>
    %283 = vector.extract_strided_slice %278 {offsets = [0, 96], sizes = [8, 32], strides = [1, 1]} : vector<8x128xf32> to vector<8x32xf32>
    %284 = arith.mulf %281, %244 : vector<8x32xf32>
    %285 = arith.mulf %280, %282 : vector<8x32xf32>
    %286 = arith.addf %284, %285 : vector<8x32xf32>
    %287 = math.tanh %286 : vector<8x32xf32>
    %288 = arith.mulf %283, %287 : vector<8x32xf32>
    %289 = tpu.concatenate %288, %267 in 1 : vector<8x32xf32>, vector<8x32xf32> -> vector<8x64xf32>
    %290 = arith.truncf %289 : vector<8x64xf32> to vector<8x64xbf16>
    %cst_67 = arith.constant dense<0.000000e+00> : vector<8x128xf32>
    %291 = tpu.matmul %290, %8, %cst_67 {dimension_numbers = #tpu.dot_dimension_numbers<[1], [0], [0], [1], [0, 0, 1, 1], [], []>} : vector<8x64xbf16>, vector<64x128xbf16>, vector<8x128xf32> -> vector<8x128xf32>
    %292 = arith.addf %291, %11 : vector<8x128xf32>
    %cst_68 = arith.constant 5.000000e-01 : f32
    %293 = vector.broadcast %cst_68 : f32 to vector<8x128xf32>
    %294 = arith.mulf %292, %293 : vector<8x128xf32>
    %295 = math.tanh %294 : vector<8x128xf32>
    %cst_69 = arith.constant 1.000000e+00 : f32
    %296 = vector.broadcast %cst_69 : f32 to vector<8x128xf32>
    %297 = arith.addf %295, %296 : vector<8x128xf32>
    %cst_70 = arith.constant 5.000000e-01 : f32
    %298 = vector.broadcast %cst_70 : f32 to vector<8x128xf32>
    %299 = arith.mulf %298, %297 : vector<8x128xf32>
    %300 = math.tanh %292 : vector<8x128xf32>
    %301 = vector.extract_strided_slice %299 {offsets = [0, 0], sizes = [8, 32], strides = [1, 1]} : vector<8x128xf32> to vector<8x32xf32>
    %302 = vector.extract_strided_slice %299 {offsets = [0, 32], sizes = [8, 32], strides = [1, 1]} : vector<8x128xf32> to vector<8x32xf32>
    %303 = vector.extract_strided_slice %300 {offsets = [0, 64], sizes = [8, 32], strides = [1, 1]} : vector<8x128xf32> to vector<8x32xf32>
    %304 = vector.extract_strided_slice %299 {offsets = [0, 96], sizes = [8, 32], strides = [1, 1]} : vector<8x128xf32> to vector<8x32xf32>
    %305 = arith.mulf %302, %265 : vector<8x32xf32>
    %306 = arith.mulf %301, %303 : vector<8x32xf32>
    %307 = arith.addf %305, %306 : vector<8x32xf32>
    %308 = math.tanh %307 : vector<8x32xf32>
    %309 = arith.mulf %304, %308 : vector<8x32xf32>
    %310 = vector.extract_strided_slice %6 {offsets = [56, 0], sizes = [8, 128], strides = [1, 1]} : vector<64x128xf32> to vector<8x128xf32>
    %311 = arith.truncf %288 : vector<8x32xf32> to vector<8x32xbf16>
    %cst_71 = arith.constant dense<0.000000e+00> : vector<8x128xf32>
    %312 = tpu.matmul %311, %7, %cst_71 {dimension_numbers = #tpu.dot_dimension_numbers<[1], [0], [0], [1], [0, 0, 1, 1], [], []>} : vector<8x32xbf16>, vector<32x128xbf16>, vector<8x128xf32> -> vector<8x128xf32>
    %313 = arith.addf %310, %312 : vector<8x128xf32>
    %cst_72 = arith.constant 5.000000e-01 : f32
    %314 = vector.broadcast %cst_72 : f32 to vector<8x128xf32>
    %315 = arith.mulf %313, %314 : vector<8x128xf32>
    %316 = math.tanh %315 : vector<8x128xf32>
    %cst_73 = arith.constant 1.000000e+00 : f32
    %317 = vector.broadcast %cst_73 : f32 to vector<8x128xf32>
    %318 = arith.addf %316, %317 : vector<8x128xf32>
    %cst_74 = arith.constant 5.000000e-01 : f32
    %319 = vector.broadcast %cst_74 : f32 to vector<8x128xf32>
    %320 = arith.mulf %319, %318 : vector<8x128xf32>
    %321 = math.tanh %313 : vector<8x128xf32>
    %322 = vector.extract_strided_slice %320 {offsets = [0, 0], sizes = [8, 32], strides = [1, 1]} : vector<8x128xf32> to vector<8x32xf32>
    %323 = vector.extract_strided_slice %320 {offsets = [0, 32], sizes = [8, 32], strides = [1, 1]} : vector<8x128xf32> to vector<8x32xf32>
    %324 = vector.extract_strided_slice %321 {offsets = [0, 64], sizes = [8, 32], strides = [1, 1]} : vector<8x128xf32> to vector<8x32xf32>
    %325 = vector.extract_strided_slice %320 {offsets = [0, 96], sizes = [8, 32], strides = [1, 1]} : vector<8x128xf32> to vector<8x32xf32>
    %326 = arith.mulf %323, %286 : vector<8x32xf32>
    %327 = arith.mulf %322, %324 : vector<8x32xf32>
    %328 = arith.addf %326, %327 : vector<8x32xf32>
    %329 = math.tanh %328 : vector<8x32xf32>
    %330 = arith.mulf %325, %329 : vector<8x32xf32>
    %331 = tpu.concatenate %330, %309 in 1 : vector<8x32xf32>, vector<8x32xf32> -> vector<8x64xf32>
    %332 = arith.truncf %331 : vector<8x64xf32> to vector<8x64xbf16>
    %cst_75 = arith.constant dense<0.000000e+00> : vector<8x128xf32>
    %333 = tpu.matmul %332, %8, %cst_75 {dimension_numbers = #tpu.dot_dimension_numbers<[1], [0], [0], [1], [0, 0, 1, 1], [], []>} : vector<8x64xbf16>, vector<64x128xbf16>, vector<8x128xf32> -> vector<8x128xf32>
    %334 = arith.addf %333, %11 : vector<8x128xf32>
    %cst_76 = arith.constant 5.000000e-01 : f32
    %335 = vector.broadcast %cst_76 : f32 to vector<8x128xf32>
    %336 = arith.mulf %334, %335 : vector<8x128xf32>
    %337 = math.tanh %336 : vector<8x128xf32>
    %cst_77 = arith.constant 1.000000e+00 : f32
    %338 = vector.broadcast %cst_77 : f32 to vector<8x128xf32>
    %339 = arith.addf %337, %338 : vector<8x128xf32>
    %cst_78 = arith.constant 5.000000e-01 : f32
    %340 = vector.broadcast %cst_78 : f32 to vector<8x128xf32>
    %341 = arith.mulf %340, %339 : vector<8x128xf32>
    %342 = math.tanh %334 : vector<8x128xf32>
    %343 = vector.extract_strided_slice %341 {offsets = [0, 0], sizes = [8, 32], strides = [1, 1]} : vector<8x128xf32> to vector<8x32xf32>
    %344 = vector.extract_strided_slice %341 {offsets = [0, 32], sizes = [8, 32], strides = [1, 1]} : vector<8x128xf32> to vector<8x32xf32>
    %345 = vector.extract_strided_slice %342 {offsets = [0, 64], sizes = [8, 32], strides = [1, 1]} : vector<8x128xf32> to vector<8x32xf32>
    %346 = vector.extract_strided_slice %341 {offsets = [0, 96], sizes = [8, 32], strides = [1, 1]} : vector<8x128xf32> to vector<8x32xf32>
    %347 = arith.mulf %344, %307 : vector<8x32xf32>
    %348 = arith.mulf %343, %345 : vector<8x32xf32>
    %349 = arith.addf %347, %348 : vector<8x32xf32>
    %350 = math.tanh %349 : vector<8x32xf32>
    %351 = arith.mulf %346, %350 : vector<8x32xf32>
    %352 = tpu.concatenate %330, %351 in 0 : vector<8x32xf32>, vector<8x32xf32> -> vector<16x32xf32>
    %cst_79 = arith.constant 0.000000e+00 : f32
    %353 = vector.broadcast %cst_79 : f32 to vector<16x32xf32>
    %354 = arith.maximumf %352, %353 : vector<16x32xf32>
    %355 = arith.truncf %354 : vector<16x32xf32> to vector<16x32xbf16>
    %c0_80 = arith.constant 0 : index
    %c0_81 = arith.constant 0 : index
    %356 = vector.load %arg6[%c0_80, %c0_81] : memref<32x128xbf16, #tpu.memory_space<vmem>>, vector<32x128xbf16>
    %cst_82 = arith.constant dense<0.000000e+00> : vector<16x128xf32>
    %357 = tpu.matmul %355, %356, %cst_82 {dimension_numbers = #tpu.dot_dimension_numbers<[1], [0], [0], [1], [0, 0, 1, 1], [], []>} : vector<16x32xbf16>, vector<32x128xbf16>, vector<16x128xf32> -> vector<16x128xf32>
    %c0_83 = arith.constant 0 : index
    %c0_84 = arith.constant 0 : index
    %358 = vector.load %arg7[%c0_83, %c0_84] : memref<1x128xf32, #tpu.memory_space<vmem>>, vector<1x128xf32>
    %359 = vector.broadcast %358 : vector<1x128xf32> to vector<16x128xf32>
    %360 = arith.addf %357, %359 : vector<16x128xf32>
    %cst_85 = arith.constant 0.000000e+00 : f32
    %361 = vector.broadcast %cst_85 : f32 to vector<16x128xf32>
    %362 = arith.maximumf %360, %361 : vector<16x128xf32>
    %363 = arith.truncf %362 : vector<16x128xf32> to vector<16x128xbf16>
    %c0_86 = arith.constant 0 : index
    %c0_87 = arith.constant 0 : index
    %364 = vector.load %arg8[%c0_86, %c0_87] : memref<128x3xbf16, #tpu.memory_space<vmem>>, vector<128x3xbf16>
    %cst_88 = arith.constant dense<0.000000e+00> : vector<16x3xf32>
    %365 = tpu.matmul %363, %364, %cst_88 {dimension_numbers = #tpu.dot_dimension_numbers<[1], [0], [0], [1], [0, 0, 1, 1], [], []>} : vector<16x128xbf16>, vector<128x3xbf16>, vector<16x3xf32> -> vector<16x3xf32>
    %c0_89 = arith.constant 0 : index
    %c0_90 = arith.constant 0 : index
    %366 = vector.load %arg9[%c0_89, %c0_90] : memref<1x3xf32, #tpu.memory_space<vmem>>, vector<1x3xf32>
    %367 = vector.broadcast %366 : vector<1x3xf32> to vector<16x3xf32>
    %368 = arith.addf %365, %367 : vector<16x3xf32>
    %c0_91 = arith.constant 0 : index
    %c0_92 = arith.constant 0 : index
    %369 = vector.load %arg10[%c0_91, %c0_92] : memref<16x3xf32, #tpu.memory_space<vmem>>, vector<16x3xf32>
    tpu.vector_store %arg10[%c0_91, %c0_92], %368 {strides = array<i32>} : memref<16x3xf32, #tpu.memory_space<vmem>>, vector<16x3xf32>,
    return
  }
}

</mosaic_0001>

<bundles_post_ra>
// kernel: tpu_custom_call.1
= control target key start
LH: loop header
LB: loop body
LE: loop exit
PB: predicated region body
PF: predicated region fallthrough
CT: control target
= control target key end

     0   :  { %vm66_vm0 = vcmask 1041408   ;;  %vm53_vm1 = vcmask 31744   ;;  %v1211_v7 = vmov 0   ;;  %s1212_s23 = smov 64   ;;  %vm127_vm2 = vcmask 261120   ;;  %s1557_s1 = inlined_call_operand.vmem [shape: bf16[4,128], index: 1, kind: input, shape index: {}]   ;;  %s1558_s2 = inlined_call_operand.vmem [shape: bf16[32,128], index: 2, kind: input, shape index: {}]   ;;  %s1559_s0 = inlined_call_operand.vmem [shape: f32[64,4], index: 0, kind: input, shape index: {}]   ;;  %s1560_s3 = inlined_call_operand.vmem [shape: f32[1,128], index: 3, kind: input, shape index: {}]   ;;  %s1561_s4 = inlined_call_operand.vmem [shape: bf16[64,128], index: 4, kind: input, shape index: {}]   ;;  %s1562_s5 = inlined_call_operand.vmem [shape: f32[1,128], index: 5, kind: input, shape index: {}]   ;;  %s1563_s6 = inlined_call_operand.vmem [shape: bf16[32,128], index: 6, kind: input, shape index: {}]   ;;  %s1564_s7 = inlined_call_operand.vmem [shape: f32[1,128], index: 7, kind: input, shape index: {}]   ;;  %s1565_s8 = inlined_call_operand.vmem [shape: bf16[128,3], index: 8, kind: input, shape index: {}]   ;;  %s1566_s9 = inlined_call_operand.vmem [shape: f32[1,3], index: 9, kind: input, shape index: {}]   ;;  %s1567_s10 = inlined_call_operand.vmem [shape: f32[16,3], index: 10, kind: output, shape index: {}]  }
   0x1   :  { %v48_v0 = vld [vmem:[%s1557_s1] sm:$0x3]  ;;  %v1275_v1 = vld [vmem:[%s1558_s2 + $0x8] sm:$0xff]  ;;  %v1314_v28 = vld [vmem:[%s1561_s4 + $0x18] sm:$0xff]  ;;  %vm197_vm3 = vcmask 523264   ;;  %vm1001_vm4 = vcmask 23552  }
   0x2   :  { %v36_v2 = vld [vmem:[%s1559_s0] sm:$0xff]  ;;  %v68_v3 = vsel %vm66_vm0, %v48_v0, 0  ;;  %v37_v4 = vld [vmem:[%s1559_s0 + $0x8] sm:$0xff]  ;;  %137 = vmatpush.bf16.msra.mxu1 %v1275_v1  ;;  %249 = vmatpush.bf16.msra.mxu3 %v1275_v1  ;;  %v1320_v29 = vld [vmem:[%s1561_s4 + $0x10] sm:$0xff] }
   0x3   :  { %77 = vmatpush.bf16.msra.mxu0 %v68_v3  ;;  %v44_v5 = vpack.c.bf16 %v37_v4, %v36_v2  ;;  %v1287_v6 = vld [vmem:[%s1558_s2] sm:$0xff]  ;;  %205 = vmatpush.bf16.msra.mxu2 %v1314_v28  ;;  %v1328_v30 = vld [vmem:[%s1561_s4 + $0x8] sm:$0xff] }
   0x4   :  { %v1300_v8 = vld [vmem:[%s1560_s3] ss:$0 sm:$0xff]  ;;  %s1213_s3 = smov 32  }
   0x5   :  { %v1338_v31 = vld [vmem:[%s1561_s4] sm:$0xff] }
   0x6   :  { %1008 = vmatmul.msk.bf16.vlgmr.msra.gmra.mxu0 %vm53_vm1, %v44_v5  ;;  %138 = vmatpush.bf16.msra.mxu1 %v1287_v6  ;;  %v1359_v42 = vld [vmem:[%s1562_s5] ss:$0 sm:$0xff] }
   0x7   :  { %704 = vmatpush.bf16.msrb.mxu0 %v1275_v1  ;;  %250 = vmatpush.bf16.msra.mxu3 %v1287_v6 }
   0x8   :  { %206 = vmatpush.bf16.msra.mxu2 %v1320_v29 }
   0x9   :  { %139 = vmatmul.bf16.vlgmr.msra.gmra.mxu1 %v1211_v7 }
   0xa   :  { %431 = vmatpush.bf16.msrb.mxu1 %v1275_v1 }
   0xb   :  { %705 = vmatpush.bf16.msrb.mxu0 %v1287_v6  ;;  %296 = vmatpush.bf16.msrb.mxu3 %v1314_v28 }
   0xc   :  { %207 = vmatpush.bf16.msra.mxu2 %v1328_v30 }
   0xe   :  { %432 = vmatpush.bf16.msrb.mxu1 %v1287_v6 }
   0xf   :  { %297 = vmatpush.bf16.msrb.mxu3 %v1320_v29 }
  0x10   :  { %208 = vmatpush.bf16.msra.mxu2 %v1338_v31 }
  0x12   :  { %569 = vmatpush.bf16.msra.mxu1 %v1314_v28 }
  0x13   :  { %298 = vmatpush.bf16.msrb.mxu3 %v1328_v30 }
  0x14   :  { %387 = vmatpush.bf16.msrb.mxu2 %v1314_v28 }
  0x16   :  { %570 = vmatpush.bf16.msra.mxu1 %v1320_v29 }
  0x17   :  { %299 = vmatpush.bf16.msrb.mxu3 %v1338_v31 }
  0x18   :  { %388 = vmatpush.bf16.msrb.mxu2 %v1320_v29 }
  0x1a   :  { %571 = vmatpush.bf16.msra.mxu1 %v1328_v30 }
  0x1c   :  { %389 = vmatpush.bf16.msrb.mxu2 %v1328_v30 }
  0x1e   :  { %572 = vmatpush.bf16.msra.mxu1 %v1338_v31 }
  0x20   :  { %390 = vmatpush.bf16.msrb.mxu2 %v1338_v31 }
  0x83   :  { %v79_v9 = vpop.f32.mrf.mxu0 }
  0x84   :  { %v80_v10 = vadd.f32 %v1300_v8, %v79_v9 }
  0x86   :  { %v140_v11 = vpop.f32.mrf.mxu1 }
  0x87   :  { %v144_v12 = vadd.f32 %v140_v11, %v80_v10  ;;  %v38_v11 = vld [vmem:[%s1559_s0 + $0x10] sm:$0xff] }
  0x89   :  { %1115 = vtanh.f32 %v144_v12  ;;  %v145_v15 = vmul.f32 0.5, %v144_v12  ;;  %v39_v12 = vld [vmem:[%s1559_s0 + $0x18] sm:$0xff] }
  0x8b   :  { %1117 = vtanh.f32 %v145_v15  ;;  %v81_v36 = vpop.f32.mrf.mxu0 }
  0x8c   :  { %v82_v37 = vadd.f32 %v1300_v8, %v81_v36 }
  0x8e   :  { %v142_v13 = vpop.f32.mrf.mxu1 }
  0x8f   :  { %v1116_v14 = vpop.eup %1115  ;;  %v45_v13 = vpack.c.bf16 %v39_v12, %v38_v11 }
  0x90   :  { %152 = vrot.lane.b32.xlu0 %v1116_v14, %s1212_s23 }
  0x91   :  { %v1118_v16 = vpop.eup %1117  ;;  %1009 = vmatmul.msk.bf16.gmra.mxu0 %vm53_vm1, %v45_v13 }
  0x92   :  { %v147_v17 = vadd.f32 1.0, %v1118_v16 }
  0x94   :  { %v148_v18 = vmul.f32 0.5, %v147_v17 }
  0x96   :  { %v150_v21 = vmul.f32 0.0, %v148_v18 }
 0x102   :  { %v153_v19 = vpop.permute.xlu0 %152 }
 0x103   :  { %v155_v20 = vmul.f32 %v153_v19, %v148_v18 }
 0x105   :  { %157 = vrot.lane.b32.xlu0 %v155_v20, %s1213_s3 }
 0x177   :  { %v158_v22 = vpop.permute.xlu0 %157 }
 0x178   :  { %v1305_v23 = vadd.f32 %v158_v22, %v150_v21 }
 0x17a   :  { %1119 = vtanh.f32 %v1305_v23 }
 0x180   :  { %v1120_v24 = vpop.eup %1119 }
 0x181   :  { %163 = vrot.lane.b32.xlu1 %v1120_v24, %s1212_s23 }
 0x1f3   :  { %v164_v25 = vpop.permute.xlu1 %163 }
 0x1f4   :  { %v166_v26 = vmul.f32 %v164_v25, %v148_v18 }
 0x1f6   :  { %168 = vrot.lane.b32.xlu1 %v166_v26, %s1213_s3  ;;  %v236_v27 = vpack.c.bf16 %v166_v26, %v166_v26 }
 0x1f8   :  { %238 = vrot.lane.b32.xlu2 %v236_v27, %s1213_s3 }
 0x252   :  { %v239_v32 = vpop.permute.xlu2 %238 }
 0x253   :  { %1037 = vmatmul.msk.bf16.vlgmr.msra.gmra.mxu3 %vm127_vm2, %v239_v32 }
 0x254   :  { %340 = vmatpush.bf16.msra.mxu3 %v1275_v1 }
 0x258   :  { %341 = vmatpush.bf16.msra.mxu3 %v1287_v6 }
 0x268   :  { %v169_v33 = vpop.permute.xlu1 %168 }
 0x269   :  { %v171_v34 = vsel %vm127_vm2, %v169_v33, 0.0 }
 0x26a   :  { %v172_v35 = vpack.c.bf16 %v171_v34, %v171_v34 }
 0x26c   :  { %1036 = vmatmul.msk.bf16.vlgmr.msra.gmra.mxu2 %vm197_vm3, %v172_v35 }
 0x26d   :  { %522 = vmatpush.bf16.msra.mxu2 %v1275_v1 }
 0x271   :  { %523 = vmatpush.bf16.msra.mxu2 %v1287_v6 }
 0x2d6   :  { %v252_v38 = vpop.f32.mrf.mxu3 }
 0x2d7   :  { %v256_v39 = vadd.f32 %v252_v38, %v82_v37 }
 0x2d9   :  { %1121 = vtanh.f32 %v256_v39  ;;  %v257_v47 = vmul.f32 0.5, %v256_v39 }
 0x2de   :  { %v254_v40 = vpop.f32.mrf.mxu3 }
 0x2df   :  { %v1122_v41 = vpop.eup %1121 }
 0x2e0   :  { %264 = vrot.lane.b32.xlu0 %v1122_v41, %s1212_s23 }
 0x2ef   :  { %v210_v43 = vpop.f32.mrf.mxu2 }
 0x2f0   :  { %v211_v44 = vadd.f32 %v1359_v42, %v210_v43 }
 0x2f2   :  { %1123 = vtanh.f32 %v211_v44  ;;  %v214_v48 = vmul.f32 0.5, %v211_v44 }
 0x2f3   :  { %1125 = vtanh.f32 %v257_v47 }
 0x2f4   :  { %1127 = vtanh.f32 %v214_v48 }
 0x2f7   :  { %v212_v45 = vpop.f32.mrf.mxu2 }
 0x2f8   :  { %v1124_v46 = vpop.eup %1123 }
 0x2f9   :  { %221 = vrot.lane.b32.xlu2 %v1124_v46, %s1212_s23  ;;  %v1126_v49 = vpop.eup %1125 }
 0x2fa   :  { %v1128_v50 = vpop.eup %1127  ;;  %v259_v51 = vadd.f32 1.0, %v1126_v49 }
 0x2fb   :  { %v216_v52 = vadd.f32 1.0, %v1128_v50 }
 0x2fc   :  { %v260_v53 = vmul.f32 0.5, %v259_v51 }
 0x2fd   :  { %v217_v55 = vmul.f32 0.5, %v216_v52 }
 0x2fe   :  { %v262_v59 = vmul.f32 %v260_v53, %v1305_v23  ;;  %v84_v23 = vpop.f32.mrf.mxu0 }
 0x2ff   :  { %v219_v63 = vmul.f32 0.0, %v217_v55  ;;  %v85_v24 = vadd.f32 %v1300_v8, %v84_v23 }
 0x352   :  { %v265_v54 = vpop.permute.xlu0 %264 }
 0x353   :  { %v267_v56 = vmul.f32 %v265_v54, %v260_v53  ;;  %v222_v57 = vpop.permute.xlu2 %221 }
 0x354   :  { %v224_v58 = vmul.f32 %v222_v57, %v217_v55 }
 0x355   :  { %269 = vrot.lane.b32.xlu2 %v267_v56, %s1213_s3 }
 0x356   :  { %226 = vrot.lane.b32.xlu1 %v224_v58, %s1213_s3 }
 0x3af   :  { %v270_v60 = vpop.permute.xlu2 %269 }
 0x3b0   :  { %v1366_v61 = vadd.f32 %v270_v60, %v262_v59 }
 0x3b2   :  { %1129 = vtanh.f32 %v1366_v61 }
 0x3b8   :  { %v1130_v62 = vpop.eup %1129 }
 0x3b9   :  { %275 = vrot.lane.b32.xlu1 %v1130_v62, %s1212_s23 }
 0x3c8   :  { %v227_v0 = vpop.permute.xlu1 %226 }
 0x3c9   :  { %v229_v2 = vadd.f32 %v227_v0, %v219_v63 }
 0x3cb   :  { %1131 = vtanh.f32 %v229_v2 }
 0x3d1   :  { %v1132_v3 = vpop.eup %1131 }
 0x3d2   :  { %232 = vrot.lane.b32.xlu0 %v1132_v3, %s1212_s23  ;;  %v86_v3 = vpop.f32.mrf.mxu0 }
 0x42b   :  { %v276_v4 = vpop.permute.xlu1 %275 }
 0x42c   :  { %v278_v5 = vmul.f32 %v276_v4, %v260_v53  ;;  %v87_v4 = vadd.f32 %v1300_v8, %v86_v3 }
 0x42e   :  { %v327_v7 = vpack.c.bf16 %v278_v5, %v278_v5  ;;  %280 = vrot.lane.b32.xlu2 %v278_v5, %s1213_s3 }
 0x430   :  { %329 = vrot.lane.b32.xlu1 %v327_v7, %s1213_s3 }
 0x444   :  { %v233_v9 = vpop.permute.xlu0 %232 }
 0x445   :  { %v235_v10 = vmul.f32 %v233_v9, %v217_v55 }
 0x447   :  { %284 = vrot.lane.b32.xlu0 %v235_v10, %s1212_s23 }
 0x488   :  { %v281_v14 = vpop.permute.xlu2 %280 }
 0x4a2   :  { %v330_v18 = vpop.permute.xlu1 %329 }
 0x4b9   :  { %v285_v15 = vpop.permute.xlu0 %284 }
 0x4ba   :  { %v287_v16 = vsel %vm127_vm2, %v281_v14, %v285_v15 }
 0x4bb   :  { %v288_v17 = vpack.c.bf16 %v287_v16, %v287_v16 }
 0x4bd   :  { %1038 = vmatmul.msk.bf16.vlgmr.msrb.gmra.mxu3 %vm197_vm3, %v288_v17 }
 0x4be   :  { %478 = vmatpush.bf16.msrb.mxu3 %v1314_v28 }
 0x4c2   :  { %479 = vmatpush.bf16.msrb.mxu3 %v1320_v29 }
 0x4c6   :  { %480 = vmatpush.bf16.msrb.mxu3 %v1328_v30 }
 0x4ca   :  { %481 = vmatpush.bf16.msrb.mxu3 %v1338_v31 }
 0x4cd   :  { %1039 = vmatmul.msk.bf16.vlgmr.msra.gmra.mxu3 %vm127_vm2, %v330_v18 }
 0x4ce   :  { %613 = vmatpush.bf16.msra.mxu3 %v1275_v1 }
 0x4d2   :  { %614 = vmatpush.bf16.msra.mxu3 %v1287_v6 }
 0x540   :  { %v301_v19 = vpop.f32.mrf.mxu3 }
 0x541   :  { %v302_v20 = vadd.f32 %v1359_v42, %v301_v19 }
 0x543   :  { %1133 = vtanh.f32 %v302_v20  ;;  %v305_v33 = vmul.f32 0.5, %v302_v20 }
 0x548   :  { %v303_v21 = vpop.f32.mrf.mxu3 }
 0x549   :  { %v1134_v22 = vpop.eup %1133 }
 0x54a   :  { %312 = vrot.lane.b32.xlu2 %v1134_v22, %s1212_s23 }
 0x550   :  { %v343_v25 = vpop.f32.mrf.mxu3 }
 0x551   :  { %v347_v26 = vadd.f32 %v343_v25, %v85_v24 }
 0x553   :  { %1135 = vtanh.f32 %v347_v26  ;;  %v348_v39 = vmul.f32 0.5, %v347_v26 }
 0x554   :  { %1137 = vtanh.f32 %v305_v33 }
 0x555   :  { %1139 = vtanh.f32 %v348_v39 }
 0x558   :  { %v345_v27 = vpop.f32.mrf.mxu3 }
 0x559   :  { %v1136_v32 = vpop.eup %1135 }
 0x55a   :  { %355 = vrot.lane.b32.xlu0 %v1136_v32, %s1212_s23  ;;  %v1138_v34 = vpop.eup %1137 }
 0x55b   :  { %v307_v35 = vadd.f32 1.0, %v1138_v34  ;;  %v1140_v40 = vpop.eup %1139 }
 0x55c   :  { %v350_v41 = vadd.f32 1.0, %v1140_v40 }
 0x55d   :  { %v308_v36 = vmul.f32 0.5, %v307_v35 }
 0x55e   :  { %v351_v43 = vmul.f32 0.5, %v350_v41 }
 0x55f   :  { %v310_v46 = vmul.f32 %v308_v36, %v229_v2 }
 0x560   :  { %v353_v50 = vmul.f32 %v351_v43, %v1366_v61 }
 0x5a4   :  { %v313_v37 = vpop.permute.xlu2 %312 }
 0x5a5   :  { %v315_v38 = vmul.f32 %v313_v37, %v308_v36 }
 0x5a7   :  { %317 = vrot.lane.b32.xlu1 %v315_v38, %s1213_s3 }
 0x5cc   :  { %v356_v44 = vpop.permute.xlu0 %355 }
 0x5cd   :  { %v358_v45 = vmul.f32 %v356_v44, %v351_v43  ;;  %v41_v44 = vld [vmem:[%s1559_s0 + $0x28] sm:$0xff] }
 0x5cf   :  { %360 = vrot.lane.b32.xlu2 %v358_v45, %s1213_s3 }
 0x619   :  { %v318_v47 = vpop.permute.xlu1 %317 }
 0x61a   :  { %v1396_v48 = vadd.f32 %v318_v47, %v310_v46 }
 0x61c   :  { %1141 = vtanh.f32 %v1396_v48 }
 0x622   :  { %v1142_v49 = vpop.eup %1141 }
 0x623   :  { %323 = vrot.lane.b32.xlu0 %v1142_v49, %s1212_s23 }
 0x629   :  { %v361_v51 = vpop.permute.xlu2 %360 }
 0x62a   :  { %v363_v52 = vadd.f32 %v361_v51, %v353_v50 }
 0x62c   :  { %1143 = vtanh.f32 %v363_v52 }
 0x632   :  { %v1144_v53 = vpop.eup %1143 }
 0x633   :  { %366 = vrot.lane.b32.xlu1 %v1144_v53, %s1212_s23 }
 0x695   :  { %v324_v54 = vpop.permute.xlu0 %323 }
 0x696   :  { %v326_v55 = vmul.f32 %v324_v54, %v308_v36 }
 0x698   :  { %375 = vrot.lane.b32.xlu0 %v326_v55, %s1212_s23 }
 0x6a5   :  { %v367_v56 = vpop.permute.xlu1 %366 }
 0x6a6   :  { %v369_v57 = vmul.f32 %v367_v56, %v351_v43  ;;  %v40_v43 = vld [vmem:[%s1559_s0 + $0x20] sm:$0xff] }
 0x6a7   :  { %v46_v45 = vpack.c.bf16 %v41_v44, %v40_v43 }
 0x6a8   :  { %v418_v58 = vpack.c.bf16 %v369_v57, %v369_v57  ;;  %371 = vrot.lane.b32.xlu2 %v369_v57, %s1213_s3 }
 0x6a9   :  { %1010 = vmatmul.msk.bf16.gmra.mxu0 %vm53_vm1, %v46_v45 }
 0x6aa   :  { %420 = vrot.lane.b32.xlu1 %v418_v58, %s1213_s3 }
 0x702   :  { %v372_v59 = vpop.permute.xlu2 %371 }
 0x70a   :  { %v376_v60 = vpop.permute.xlu0 %375 }
 0x70b   :  { %v378_v61 = vsel %vm127_vm2, %v372_v59, %v376_v60 }
 0x70c   :  { %v379_v62 = vpack.c.bf16 %v378_v61, %v378_v61 }
 0x70e   :  { %1040 = vmatmul.msk.bf16.vlgmr.msrb.gmra.mxu2 %vm197_vm3, %v379_v62 }
 0x70f   :  { %660 = vmatpush.bf16.msrb.mxu2 %v1314_v28 }
 0x713   :  { %661 = vmatpush.bf16.msrb.mxu2 %v1320_v29 }
 0x717   :  { %662 = vmatpush.bf16.msrb.mxu2 %v1328_v30 }
 0x71b   :  { %663 = vmatpush.bf16.msrb.mxu2 %v1338_v31 }
 0x71c   :  { %v421_v63 = vpop.permute.xlu1 %420 }
 0x71d   :  { %1041 = vmatmul.msk.bf16.vlgmr.msrb.gmra.mxu1 %vm127_vm2, %v421_v63 }
 0x71e   :  { %751 = vmatpush.bf16.msrb.mxu1 %v1314_v28 }
 0x722   :  { %752 = vmatpush.bf16.msrb.mxu1 %v1320_v29 }
 0x726   :  { %753 = vmatpush.bf16.msrb.mxu1 %v1328_v30  ;;  %v89_v51 = vpop.f32.mrf.mxu0 }
 0x72a   :  { %754 = vmatpush.bf16.msrb.mxu1 %v1338_v31 }
 0x791   :  { %v392_v0 = vpop.f32.mrf.mxu2 }
 0x792   :  { %v393_v2 = vadd.f32 %v1359_v42, %v392_v0 }
 0x794   :  { %1145 = vtanh.f32 %v393_v2  ;;  %v396_v16 = vmul.f32 0.5, %v393_v2 }
 0x799   :  { %v394_v5 = vpop.f32.mrf.mxu2 }
 0x79a   :  { %v1146_v7 = vpop.eup %1145  ;;  %v434_v9 = vpop.f32.mrf.mxu1 }
 0x79b   :  { %v438_v10 = vadd.f32 %v434_v9, %v87_v4  ;;  %403 = vrot.lane.b32.xlu0 %v1146_v7, %s1212_s23 }
 0x79d   :  { %1147 = vtanh.f32 %v438_v10  ;;  %v439_v13 = vmul.f32 0.5, %v438_v10 }
 0x79f   :  { %1149 = vtanh.f32 %v439_v13 }
 0x7a0   :  { %1151 = vtanh.f32 %v396_v16 }
 0x7a2   :  { %v436_v11 = vpop.f32.mrf.mxu1 }
 0x7a3   :  { %v1148_v12 = vpop.eup %1147 }
 0x7a4   :  { %446 = vrot.lane.b32.xlu2 %v1148_v12, %s1212_s23 }
 0x7a5   :  { %v1150_v14 = vpop.eup %1149 }
 0x7a6   :  { %v441_v15 = vadd.f32 1.0, %v1150_v14  ;;  %v1152_v20 = vpop.eup %1151 }
 0x7a7   :  { %v398_v21 = vadd.f32 1.0, %v1152_v20 }
 0x7a8   :  { %v442_v17 = vmul.f32 0.5, %v441_v15 }
 0x7a9   :  { %v399_v22 = vmul.f32 0.5, %v398_v21 }
 0x7aa   :  { %v444_v32 = vmul.f32 %v442_v17, %v363_v52 }
 0x7ab   :  { %v401_v25 = vmul.f32 %v399_v22, %v1396_v48 }
 0x7fe   :  { %v447_v18 = vpop.permute.xlu2 %446 }
 0x7ff   :  { %v449_v19 = vmul.f32 %v447_v18, %v442_v17 }
 0x801   :  { %451 = vrot.lane.b32.xlu1 %v449_v19, %s1213_s3 }
 0x80d   :  { %v404_v23 = vpop.permute.xlu0 %403 }
 0x80e   :  { %v406_v24 = vmul.f32 %v404_v23, %v399_v22 }
 0x810   :  { %408 = vrot.lane.b32.xlu2 %v406_v24, %s1213_s3  ;;  %v91_v24 = vpop.f32.mrf.mxu0 }
 0x86a   :  { %v409_v26 = vpop.permute.xlu2 %408 }
 0x86b   :  { %v1423_v27 = vadd.f32 %v409_v26, %v401_v25  ;;  %v92_v25 = vadd.f32 %v1300_v8, %v91_v24 }
 0x86d   :  { %1153 = vtanh.f32 %v1423_v27 }
 0x873   :  { %v1154_v33 = vpop.eup %1153  ;;  %v452_v34 = vpop.permute.xlu1 %451 }
 0x874   :  { %v454_v35 = vadd.f32 %v452_v34, %v444_v32  ;;  %414 = vrot.lane.b32.xlu1 %v1154_v33, %s1212_s23 }
 0x876   :  { %1155 = vtanh.f32 %v454_v35 }
 0x87c   :  { %v1156_v36 = vpop.eup %1155 }
 0x87d   :  { %457 = vrot.lane.b32.xlu0 %v1156_v36, %s1212_s23 }
 0x8e6   :  { %v415_v37 = vpop.permute.xlu1 %414 }
 0x8e7   :  { %v417_v38 = vmul.f32 %v415_v37, %v399_v22 }
 0x8e9   :  { %466 = vrot.lane.b32.xlu1 %v417_v38, %s1212_s23 }
 0x8ef   :  { %v458_v39 = vpop.permute.xlu0 %457 }
 0x8f0   :  { %v460_v40 = vmul.f32 %v458_v39, %v442_v17 }
 0x8f2   :  { %v509_v41 = vpack.c.bf16 %v460_v40, %v460_v40  ;;  %462 = vrot.lane.b32.xlu0 %v460_v40, %s1213_s3 }
 0x8f4   :  { %511 = vrot.lane.b32.xlu2 %v509_v41, %s1213_s3 }
 0x94e   :  { %v512_v46 = vpop.permute.xlu2 %511 }
 0x94f   :  { %1043 = vmatmul.msk.bf16.vlgmr.msra.gmra.mxu2 %vm127_vm2, %v512_v46 }
 0x950   :  { %842 = vmatpush.bf16.msra.mxu2 %v1314_v28  ;;  %v90_v28 = vadd.f32 %v1300_v8, %v89_v51 }
 0x954   :  { %843 = vmatpush.bf16.msra.mxu2 %v1320_v29 }
 0x958   :  { %844 = vmatpush.bf16.msra.mxu2 %v1328_v30 }
 0x95b   :  { %v467_v47 = vpop.permute.xlu1 %466 }
 0x95c   :  { %845 = vmatpush.bf16.msra.mxu2 %v1338_v31 }
 0x964   :  { %v463_v48 = vpop.permute.xlu0 %462 }
 0x965   :  { %v469_v49 = vsel %vm127_vm2, %v463_v48, %v467_v47 }
 0x966   :  { %v470_v50 = vpack.c.bf16 %v469_v49, %v469_v49 }
 0x968   :  { %1042 = vmatmul.msk.bf16.vlgmr.msrb.gmra.mxu3 %vm197_vm3, %v470_v50 }
 0x969   :  { %795 = vmatpush.bf16.msrb.mxu3 %v1275_v1 }
 0x96d   :  { %796 = vmatpush.bf16.msrb.mxu3 %v1287_v6 }
 0x9d2   :  { %v525_v52 = vpop.f32.mrf.mxu2 }
 0x9d3   :  { %v529_v29 = vadd.f32 %v525_v52, %v90_v28 }
 0x9d5   :  { %1157 = vtanh.f32 %v529_v29  ;;  %v530_v1 = vmul.f32 0.5, %v529_v29 }
 0x9da   :  { %v527_v30 = vpop.f32.mrf.mxu2 }
 0x9db   :  { %v1158_v53 = vpop.eup %1157 }
 0x9dc   :  { %537 = vrot.lane.b32.xlu2 %v1158_v53, %s1212_s23 }
 0x9eb   :  { %v483_v31 = vpop.f32.mrf.mxu3 }
 0x9ec   :  { %v484_v54 = vadd.f32 %v1359_v42, %v483_v31 }
 0x9ee   :  { %1159 = vtanh.f32 %v484_v54  ;;  %v487_v61 = vmul.f32 0.5, %v484_v54 }
 0x9ef   :  { %1161 = vtanh.f32 %v530_v1 }
 0x9f0   :  { %1163 = vtanh.f32 %v487_v61 }
 0x9f3   :  { %v485_v55 = vpop.f32.mrf.mxu3 }
 0x9f4   :  { %v1160_v56 = vpop.eup %1159 }
 0x9f5   :  { %494 = vrot.lane.b32.xlu0 %v1160_v56, %s1212_s23  ;;  %v1162_v6 = vpop.eup %1161 }
 0x9f6   :  { %v532_v57 = vadd.f32 1.0, %v1162_v6  ;;  %v1164_v62 = vpop.eup %1163 }
 0x9f7   :  { %v489_v63 = vadd.f32 1.0, %v1164_v62 }
 0x9f8   :  { %v533_v58 = vmul.f32 0.5, %v532_v57 }
 0x9f9   :  { %v490_v0 = vmul.f32 0.5, %v489_v63 }
 0x9fa   :  { %v535_v4 = vmul.f32 %v533_v58, %v454_v35 }
 0x9fb   :  { %v492_v10 = vmul.f32 %v490_v0, %v1423_v27 }
 0xa36   :  { %v538_v59 = vpop.permute.xlu2 %537 }
 0xa37   :  { %v540_v60 = vmul.f32 %v538_v59, %v533_v58  ;;  %v43_v59 = vld [vmem:[%s1559_s0 + $0x38] sm:$0xff] }
 0xa39   :  { %542 = vrot.lane.b32.xlu1 %v540_v60, %s1213_s3 }
 0xa67   :  { %v495_v2 = vpop.permute.xlu0 %494 }
 0xa68   :  { %v497_v3 = vmul.f32 %v495_v2, %v490_v0 }
 0xa6a   :  { %499 = vrot.lane.b32.xlu2 %v497_v3, %s1213_s3 }
 0xaab   :  { %v543_v5 = vpop.permute.xlu1 %542 }
 0xaac   :  { %v545_v7 = vadd.f32 %v543_v5, %v535_v4 }
 0xaae   :  { %1165 = vtanh.f32 %v545_v7 }
 0xab4   :  { %v1166_v9 = vpop.eup %1165 }
 0xab5   :  { %548 = vrot.lane.b32.xlu0 %v1166_v9, %s1212_s23 }
 0xac4   :  { %v500_v11 = vpop.permute.xlu2 %499 }
 0xac5   :  { %v502_v12 = vadd.f32 %v500_v11, %v492_v10 }
 0xac7   :  { %1167 = vtanh.f32 %v502_v12 }
 0xacd   :  { %v1168_v13 = vpop.eup %1167 }
 0xace   :  { %505 = vrot.lane.b32.xlu1 %v1168_v13, %s1212_s23 }
 0xb27   :  { %v549_v14 = vpop.permute.xlu0 %548 }
 0xb28   :  { %v551_v15 = vmul.f32 %v549_v14, %v533_v58  ;;  %v42_v58 = vld [vmem:[%s1559_s0 + $0x30] sm:$0xff] }
 0xb29   :  { %v47_v60 = vpack.c.bf16 %v43_v59, %v42_v58 }
 0xb2a   :  { %v600_v16 = vpack.c.bf16 %v551_v15, %v551_v15  ;;  %553 = vrot.lane.b32.xlu0 %v551_v15, %s1213_s3 }
 0xb2b   :  { %1011 = vmatmul.msk.bf16.gmra.mxu0 %vm53_vm1, %v47_v60 }
 0xb2c   :  { %602 = vrot.lane.b32.xlu2 %v600_v16, %s1213_s3 }
 0xb40   :  { %v506_v17 = vpop.permute.xlu1 %505 }
 0xb41   :  { %v508_v18 = vmul.f32 %v506_v17, %v490_v0 }
 0xb43   :  { %557 = vrot.lane.b32.xlu1 %v508_v18, %s1212_s23 }
 0xb86   :  { %v603_v19 = vpop.permute.xlu2 %602 }
 0xb87   :  { %1045 = vmatmul.msk.bf16.vlgmr.msra.gmra.mxu3 %vm127_vm2, %v603_v19 }
 0xb9c   :  { %v554_v20 = vpop.permute.xlu0 %553 }
 0xba8   :  { %v94_v3 = vpop.f32.mrf.mxu0 }
 0xba9   :  { %v95_v5 = vadd.f32 %v1300_v8, %v94_v3 }
 0xbb0   :  { %v96_v4 = vpop.f32.mrf.mxu0 }
 0xbb5   :  { %v558_v21 = vpop.permute.xlu1 %557 }
 0xbb6   :  { %v560_v22 = vsel %vm127_vm2, %v554_v20, %v558_v21 }
 0xbb7   :  { %v561_v23 = vpack.c.bf16 %v560_v22, %v560_v22 }
 0xbb9   :  { %1044 = vmatmul.msk.bf16.vlgmr.msra.gmra.mxu1 %vm197_vm3, %v561_v23 }
 0xc0a   :  { %v616_v26 = vpop.f32.mrf.mxu3 }
 0xc0b   :  { %v620_v27 = vadd.f32 %v616_v26, %v92_v25 }
 0xc0d   :  { %1169 = vtanh.f32 %v620_v27  ;;  %v621_v38 = vmul.f32 0.5, %v620_v27 }
 0xc12   :  { %v618_v32 = vpop.f32.mrf.mxu3 }
 0xc13   :  { %v1170_v33 = vpop.eup %1169 }
 0xc14   :  { %628 = vrot.lane.b32.xlu0 %v1170_v33, %s1212_s23 }
 0xc36   :  { %v574_v34 = vpop.f32.mrf.mxu1 }
 0xc37   :  { %v575_v35 = vadd.f32 %v1359_v42, %v574_v34 }
 0xc39   :  { %1171 = vtanh.f32 %v575_v35  ;;  %v578_v45 = vmul.f32 0.5, %v575_v35 }
 0xc3a   :  { %1173 = vtanh.f32 %v621_v38 }
 0xc3b   :  { %1175 = vtanh.f32 %v578_v45 }
 0xc3e   :  { %v576_v36 = vpop.f32.mrf.mxu1 }
 0xc3f   :  { %v1172_v37 = vpop.eup %1171 }
 0xc40   :  { %585 = vrot.lane.b32.xlu2 %v1172_v37, %s1212_s23  ;;  %v1174_v39 = vpop.eup %1173 }
 0xc41   :  { %v623_v40 = vadd.f32 1.0, %v1174_v39  ;;  %v1176_v46 = vpop.eup %1175 }
 0xc42   :  { %v580_v47 = vadd.f32 1.0, %v1176_v46 }
 0xc43   :  { %v624_v41 = vmul.f32 0.5, %v623_v40 }
 0xc44   :  { %v581_v48 = vmul.f32 0.5, %v580_v47 }
 0xc45   :  { %v626_v51 = vmul.f32 %v624_v41, %v545_v7 }
 0xc46   :  { %v583_v30 = vmul.f32 %v581_v48, %v502_v12 }
 0xc86   :  { %v629_v43 = vpop.permute.xlu0 %628 }
 0xc87   :  { %v631_v44 = vmul.f32 %v629_v43, %v624_v41 }
 0xc89   :  { %633 = vrot.lane.b32.xlu2 %v631_v44, %s1213_s3 }
 0xc9a   :  { %v586_v49 = vpop.permute.xlu2 %585 }
 0xc9b   :  { %v588_v50 = vmul.f32 %v586_v49, %v581_v48 }
 0xc9d   :  { %590 = vrot.lane.b32.xlu1 %v588_v50, %s1213_s3 }
 0xce3   :  { %v634_v28 = vpop.permute.xlu2 %633 }
 0xce4   :  { %v636_v52 = vadd.f32 %v634_v28, %v626_v51  ;;  %v97_v51 = vadd.f32 %v1300_v8, %v96_v4 }
 0xce6   :  { %1177 = vtanh.f32 %v636_v52 }
 0xcec   :  { %v1178_v29 = vpop.eup %1177 }
 0xced   :  { %639 = vrot.lane.b32.xlu1 %v1178_v29, %s1212_s23 }
 0xd0f   :  { %v591_v53 = vpop.permute.xlu1 %590 }
 0xd10   :  { %v593_v31 = vadd.f32 %v591_v53, %v583_v30 }
 0xd12   :  { %1179 = vtanh.f32 %v593_v31 }
 0xd18   :  { %v1180_v54 = vpop.eup %1179 }
 0xd19   :  { %596 = vrot.lane.b32.xlu0 %v1180_v54, %s1212_s23 }
 0xd5f   :  { %v640_v55 = vpop.permute.xlu1 %639 }
 0xd60   :  { %v642_v56 = vmul.f32 %v640_v55, %v624_v41 }
 0xd62   :  { %v691_v1 = vpack.c.bf16 %v642_v56, %v642_v56  ;;  %644 = vrot.lane.b32.xlu2 %v642_v56, %s1213_s3 }
 0xd64   :  { %693 = vrot.lane.b32.xlu1 %v691_v1, %s1213_s3 }
 0xd8b   :  { %v597_v6 = vpop.permute.xlu0 %596 }
 0xd8c   :  { %v599_v57 = vmul.f32 %v597_v6, %v581_v48 }
 0xd8e   :  { %648 = vrot.lane.b32.xlu0 %v599_v57, %s1212_s23 }
 0xdbc   :  { %v645_v62 = vpop.permute.xlu2 %644 }
 0xdd6   :  { %v694_v61 = vpop.permute.xlu1 %693 }
 0xdd7   :  { %1047 = vmatmul.msk.bf16.vlgmr.msrb.gmra.mxu0 %vm127_vm2, %v694_v61 }
 0xe00   :  { %v649_v63 = vpop.permute.xlu0 %648 }
 0xe01   :  { %v651_v0 = vsel %vm127_vm2, %v645_v62, %v649_v63 }
 0xe02   :  { %v652_v2 = vpack.c.bf16 %v651_v0, %v651_v0 }
 0xe04   :  { %1046 = vmatmul.msk.bf16.vlgmr.msrb.gmra.mxu2 %vm197_vm3, %v652_v2 }
 0xe54   :  { %v707_v7 = vpop.f32.mrf.mxu0 }
 0xe55   :  { %v711_v9 = vadd.f32 %v707_v7, %v95_v5 }
 0xe57   :  { %1181 = vtanh.f32 %v711_v9  ;;  %v712_v16 = vmul.f32 0.5, %v711_v9 }
 0xe5c   :  { %v709_v10 = vpop.f32.mrf.mxu0 }
 0xe5d   :  { %v1182_v11 = vpop.eup %1181 }
 0xe5e   :  { %719 = vrot.lane.b32.xlu2 %v1182_v11, %s1212_s23 }
 0xe87   :  { %v665_v12 = vpop.f32.mrf.mxu2 }
 0xe88   :  { %v666_v13 = vadd.f32 %v1359_v42, %v665_v12 }
 0xe8a   :  { %1183 = vtanh.f32 %v666_v13  ;;  %v669_v22 = vmul.f32 0.5, %v666_v13 }
 0xe8b   :  { %1185 = vtanh.f32 %v712_v16 }
 0xe8c   :  { %1187 = vtanh.f32 %v669_v22 }
 0xe8f   :  { %v667_v14 = vpop.f32.mrf.mxu2 }
 0xe90   :  { %v1184_v15 = vpop.eup %1183 }
 0xe91   :  { %676 = vrot.lane.b32.xlu0 %v1184_v15, %s1212_s23  ;;  %v1186_v17 = vpop.eup %1185 }
 0xe92   :  { %v714_v18 = vadd.f32 1.0, %v1186_v17  ;;  %v1188_v23 = vpop.eup %1187 }
 0xe93   :  { %v671_v24 = vadd.f32 1.0, %v1188_v23 }
 0xe94   :  { %v715_v19 = vmul.f32 0.5, %v714_v18 }
 0xe95   :  { %v672_v25 = vmul.f32 0.5, %v671_v24 }
 0xe96   :  { %v717_v32 = vmul.f32 %v715_v19, %v636_v52 }
 0xe97   :  { %v674_v36 = vmul.f32 %v672_v25, %v593_v31 }
 0xeb8   :  { %v720_v20 = vpop.permute.xlu2 %719 }
 0xeb9   :  { %v722_v21 = vmul.f32 %v720_v20, %v715_v19 }
 0xebb   :  { %724 = vrot.lane.b32.xlu1 %v722_v21, %s1213_s3 }
 0xf03   :  { %v677_v26 = vpop.permute.xlu0 %676 }
 0xf04   :  { %v679_v27 = vmul.f32 %v677_v26, %v672_v25 }
 0xf06   :  { %681 = vrot.lane.b32.xlu2 %v679_v27, %s1213_s3 }
 0xf2d   :  { %v725_v33 = vpop.permute.xlu1 %724 }
 0xf2e   :  { %v727_v34 = vadd.f32 %v725_v33, %v717_v32 }
 0xf30   :  { %1189 = vtanh.f32 %v727_v34 }
 0xf36   :  { %v1190_v35 = vpop.eup %1189 }
 0xf37   :  { %730 = vrot.lane.b32.xlu0 %v1190_v35, %s1212_s23 }
 0xf60   :  { %v682_v37 = vpop.permute.xlu2 %681 }
 0xf61   :  { %v684_v38 = vadd.f32 %v682_v37, %v674_v36 }
 0xf63   :  { %1191 = vtanh.f32 %v684_v38 }
 0xf69   :  { %v1192_v39 = vpop.eup %1191 }
 0xf6a   :  { %687 = vrot.lane.b32.xlu1 %v1192_v39, %s1212_s23 }
 0xfa9   :  { %v731_v40 = vpop.permute.xlu0 %730 }
 0xfaa   :  { %v733_v41 = vmul.f32 %v731_v40, %v715_v19 }
 0xfac   :  { %v782_v43 = vpack.c.bf16 %v733_v41, %v733_v41  ;;  %735 = vrot.lane.b32.xlu0 %v733_v41, %s1213_s3 }
 0xfae   :  { %784 = vrot.lane.b32.xlu2 %v782_v43, %s1213_s3 }
 0xfdc   :  { %v688_v44 = vpop.permute.xlu1 %687 }
 0xfdd   :  { %v690_v45 = vmul.f32 %v688_v44, %v672_v25 }
 0xfdf   :  { %739 = vrot.lane.b32.xlu1 %v690_v45, %s1212_s23  ;;  %v1107_v45 = vld [vmem:[%s1565_s8 + $0x38] sm:$0xff] }
 0xfe0   :  { %987 = vmatpush.bf16.msra.mxu1 %v1107_v45 }
0x1008   :  { %v785_v46 = vpop.permute.xlu2 %784 }
0x1009   :  { %1049 = vmatmul.msk.bf16.vlgmr.msrb.gmra.mxu3 %vm127_vm2, %v785_v46  ;;  %v1106_v46 = vld [vmem:[%s1565_s8 + $0x30] sm:$0xff] }
0x100a   :  { %988 = vmatpush.bf16.msra.mxu1 %v1106_v46 }
0x101e   :  { %v736_v47 = vpop.permute.xlu0 %735 }
0x1051   :  { %v740_v48 = vpop.permute.xlu1 %739 }
0x1052   :  { %v742_v49 = vsel %vm127_vm2, %v736_v47, %v740_v48  ;;  %v1105_v47 = vld [vmem:[%s1565_s8 + $0x28] sm:$0xff]  ;;  %v1104_v48 = vld [vmem:[%s1565_s8 + $0x20] sm:$0xff] }
0x1053   :  { %v743_v50 = vpack.c.bf16 %v742_v49, %v742_v49  ;;  %989 = vmatpush.bf16.msra.mxu1 %v1105_v47 }
0x1055   :  { %1048 = vmatmul.msk.bf16.vlgmr.msrb.gmra.mxu1 %vm197_vm3, %v743_v50  ;;  %v1103_v50 = vld [vmem:[%s1565_s8 + $0x18] sm:$0xff] }
0x1057   :  { %990 = vmatpush.bf16.msra.mxu1 %v1104_v48 }
0x105b   :  { %991 = vmatpush.bf16.msra.mxu1 %v1103_v50 }
0x108c   :  { %v798_v28 = vpop.f32.mrf.mxu3 }
0x108d   :  { %v802_v52 = vadd.f32 %v798_v28, %v97_v51  ;;  %v1102_v51 = vld [vmem:[%s1565_s8 + $0x10] sm:$0xff]  ;;  %v1101_v28 = vld [vmem:[%s1565_s8 + $0x8] sm:$0xff] }
0x108e   :  { %992 = vmatpush.bf16.msra.mxu1 %v1102_v51 }
0x108f   :  { %1193 = vtanh.f32 %v802_v52  ;;  %v803_v56 = vmul.f32 0.5, %v802_v52  ;;  %v1100_v52 = vld [vmem:[%s1565_s8] sm:$0xff] }
0x1092   :  { %993 = vmatpush.bf16.msra.mxu1 %v1101_v28 }
0x1094   :  { %v800_v29 = vpop.f32.mrf.mxu3 }
0x1095   :  { %v1194_v30 = vpop.eup %1193 }
0x1096   :  { %810 = vrot.lane.b32.xlu0 %v1194_v30, %s1212_s23  ;;  %994 = vmatpush.bf16.msra.mxu1 %v1100_v52  ;;  %v1113_v30 = vld [vmem:[%s1564_s7] ss:$0 sm:$0xff] }
0x10d2   :  { %v756_v53 = vpop.f32.mrf.mxu1 }
0x10d3   :  { %v757_v31 = vadd.f32 %v1359_v42, %v756_v53 }
0x10d5   :  { %1195 = vtanh.f32 %v757_v31  ;;  %v760_v59 = vmul.f32 0.5, %v757_v31 }
0x10d6   :  { %1197 = vtanh.f32 %v803_v56 }
0x10d7   :  { %1199 = vtanh.f32 %v760_v59 }
0x10da   :  { %v758_v54 = vpop.f32.mrf.mxu1 }
0x10db   :  { %v1196_v55 = vpop.eup %1195 }
0x10dc   :  { %767 = vrot.lane.b32.xlu2 %v1196_v55, %s1212_s23  ;;  %v1198_v1 = vpop.eup %1197 }
0x10dd   :  { %v805_v6 = vadd.f32 1.0, %v1198_v1  ;;  %v1200_v60 = vpop.eup %1199 }
0x10de   :  { %v762_v61 = vadd.f32 1.0, %v1200_v60 }
0x10df   :  { %v806_v8 = vmul.f32 0.5, %v805_v6  ;;  %v1114_v6 = vld [vmem:[%s1566_s9] ss:$0 sm:$0xff] }
0x10e0   :  { %v763_v62 = vmul.f32 0.5, %v762_v61 }
0x10e1   :  { %v808_v2 = vmul.f32 %v806_v8, %v727_v34 }
0x10e2   :  { %v765_v7 = vmul.f32 %v763_v62, %v684_v38  ;;  %v1098_v38 = vld [vmem:[%s1563_s6] sm:$0xff] }
0x1108   :  { %v811_v57 = vpop.permute.xlu0 %810 }
0x1109   :  { %v813_v58 = vmul.f32 %v811_v57, %v806_v8 }
0x110b   :  { %815 = vrot.lane.b32.xlu2 %v813_v58, %s1213_s3 }
0x1136   :  { %v768_v63 = vpop.permute.xlu2 %767 }
0x1137   :  { %v770_v0 = vmul.f32 %v768_v63, %v763_v62 }
0x1139   :  { %772 = vrot.lane.b32.xlu1 %v770_v0, %s1213_s3 }
0x1165   :  { %v816_v3 = vpop.permute.xlu2 %815 }
0x1166   :  { %v818_v4 = vadd.f32 %v816_v3, %v808_v2 }
0x1168   :  { %1201 = vtanh.f32 %v818_v4 }
0x116e   :  { %v1202_v5 = vpop.eup %1201 }
0x116f   :  { %821 = vrot.lane.b32.xlu1 %v1202_v5, %s1212_s23 }
0x11ab   :  { %v773_v9 = vpop.permute.xlu1 %772 }
0x11ac   :  { %v775_v10 = vadd.f32 %v773_v9, %v765_v7 }
0x11ae   :  { %1203 = vtanh.f32 %v775_v10 }
0x11b4   :  { %v1204_v11 = vpop.eup %1203 }
0x11b5   :  { %778 = vrot.lane.b32.xlu0 %v1204_v11, %s1212_s23 }
0x11e1   :  { %v822_v12 = vpop.permute.xlu1 %821 }
0x11e2   :  { %v824_v13 = vmul.f32 %v822_v12, %v806_v8 }
0x11e4   :  { %826 = vrot.lane.b32.xlu2 %v824_v13, %s1213_s3  ;;  %v873_v41 = vmax.f32 %v824_v13, 0.0 }
0x1227   :  { %v779_v14 = vpop.permute.xlu0 %778 }
0x1228   :  { %v781_v15 = vmul.f32 %v779_v14, %v763_v62 }
0x122a   :  { %830 = vrot.lane.b32.xlu0 %v781_v15, %s1212_s23 }
0x123e   :  { %v827_v16 = vpop.permute.xlu2 %826 }
0x129c   :  { %v831_v17 = vpop.permute.xlu0 %830 }
0x129d   :  { %v833_v18 = vsel %vm127_vm2, %v827_v16, %v831_v17 }
0x129e   :  { %v834_v19 = vpack.c.bf16 %v833_v18, %v833_v18 }
0x12a0   :  { %1050 = vmatmul.msk.bf16.vlgmr.msra.gmra.mxu2 %vm197_vm3, %v834_v19 }
0x1323   :  { %v847_v20 = vpop.f32.mrf.mxu2 }
0x1324   :  { %v848_v21 = vadd.f32 %v1359_v42, %v847_v20  ;;  %v1099_v42 = vld [vmem:[%s1563_s6 + $0x8] sm:$0xff] }
0x1325   :  { %908 = vmatpush.bf16.msra.mxu0 %v1099_v42 }
0x1326   :  { %1205 = vtanh.f32 %v848_v21  ;;  %v851_v24 = vmul.f32 0.5, %v848_v21 }
0x1328   :  { %1207 = vtanh.f32 %v851_v24 }
0x1329   :  { %909 = vmatpush.bf16.msra.mxu0 %v1098_v38 }
0x132b   :  { %v849_v22 = vpop.f32.mrf.mxu2 }
0x132c   :  { %v1206_v23 = vpop.eup %1205 }
0x132d   :  { %858 = vrot.lane.b32.xlu1 %v1206_v23, %s1212_s23 }
0x132e   :  { %v1208_v25 = vpop.eup %1207 }
0x132f   :  { %v853_v26 = vadd.f32 1.0, %v1208_v25 }
0x1331   :  { %v854_v27 = vmul.f32 0.5, %v853_v26 }
0x1333   :  { %v856_v34 = vmul.f32 %v854_v27, %v775_v10 }
0x139f   :  { %v859_v32 = vpop.permute.xlu1 %858 }
0x13a0   :  { %v861_v33 = vmul.f32 %v859_v32, %v854_v27 }
0x13a2   :  { %863 = vrot.lane.b32.xlu2 %v861_v33, %s1213_s3 }
0x13fc   :  { %v864_v35 = vpop.permute.xlu2 %863 }
0x13fd   :  { %v866_v36 = vadd.f32 %v864_v35, %v856_v34 }
0x13ff   :  { %1209 = vtanh.f32 %v866_v36 }
0x1405   :  { %v1210_v37 = vpop.eup %1209 }
0x1406   :  { %869 = vrot.lane.b32.xlu0 %v1210_v37, %s1212_s23 }
0x1478   :  { %v870_v39 = vpop.permute.xlu0 %869 }
0x1479   :  { %v872_v40 = vmul.f32 %v870_v39, %v854_v27 }
0x147b   :  { %v874_v43 = vmax.f32 %v872_v40, 0.0 }
0x147d   :  { %v875_v44 = vpack.c.bf16 %v874_v43, %v873_v41 }
0x147f   :  { %885 = vrot.lane.b32.xlu1 %v875_v44, %s1213_s3 }
0x14f1   :  { %v886_v49 = vpop.permute.xlu1 %885 }
0x14f2   :  { %1059 = vmatmul.msk.bf16.vlgmr.msra.gmra.mxu0 %vm127_vm2, %v886_v49 }
0x156f   :  { %v911_v29 = vpop.f32.mrf.mxu0 }
0x1570   :  { %v912_v53 = vadd.f32 %v1113_v30, %v911_v29 }
0x1572   :  { %v916_v55 = vmax.f32 %v912_v53, 0.0 }
0x1577   :  { %v913_v31 = vpop.f32.mrf.mxu0 }
0x1578   :  { %v914_v54 = vadd.f32 %v1113_v30, %v913_v31 }
0x157a   :  { %v917_v56 = vmax.f32 %v914_v54, 0.0 }
0x157c   :  { %v918_v1 = vpack.c.bf16 %v917_v56, %v916_v55 }
0x157e   :  { %995 = vmatmul.bf16.vlgmr.msra.gmra.mxu1 %v918_v1 }
0x15fb   :  { %v996_v8 = vpop.f32.mrf.mxu1 }
0x15fc   :  { %v997_v57 = vadd.f32 %v1114_v6, %v996_v8 }
0x15fe   :  { %1002 = vst.msk [vmem:[%s1567_s10] sm:$0xff] %vm1001_vm4, %v997_v57 }
0x1603   :  { %v998_v58 = vpop.f32.mrf.mxu1 }
0x1604   :  { %v999_v59 = vadd.f32 %v1114_v6, %v998_v58 }
0x1606   :  { %1003 = vst.msk [vmem:[%s1567_s10 + $0x8] sm:$0xff] %vm1001_vm4, %v999_v59 }

</bundles_post_ra>
